<compile_context>
chip_gen: v5e
topology: v5e:2x2
jax: 0.10.0
libtpu: 0.0.40
codegen_flags: <defaults>
</compile_context>

<pallas_src>
import jax
import jax.numpy as jnp
from jax.experimental import pallas as pl
from jax.experimental.pallas import tpu as pltpu

HIDDEN = 512
LANE = 128          # pad n_actions up to a multiple of this for lane-dense stores
NEG_INF = -1e30     # finite "-inf" for padded logits (exp underflows to exactly 0)


def _cdiv(a, b):
    return -(-a // b)


def _round_up(x, m):
    return _cdiv(x, m) * m


def policy_kernel(x_ref, w1_ref, b1_ref, w2_ref, b2_ref, w3_ref, b3_ref, out_ref):
    # fc1 + relu: bf16 operands on the MXU, f32 accumulation, f32 elementwise.
    x = x_ref[...].astype(jnp.bfloat16)
    h1 = jnp.dot(x, w1_ref[...], preferred_element_type=jnp.float32) + b1_ref[...]
    h1 = jnp.maximum(h1, 0.0)
    # fc2 + relu
    h2 = jnp.dot(h1.astype(jnp.bfloat16), w2_ref[...],
                 preferred_element_type=jnp.float32) + b2_ref[...]
    h2 = jnp.maximum(h2, 0.0)
    # fc3 (output padded to a 128-lane multiple; padded bias = -1e30 -> prob 0)
    logits = jnp.dot(h2.astype(jnp.bfloat16), w3_ref[...],
                     preferred_element_type=jnp.float32) + b3_ref[...]
    # softmax over last axis (PyTorch dim=1 of the (B, n_actions) output).
    # Exact normalization: division instead of approx reciprocal so rows sum
    # to 1 to float32 precision (fixes the previous assertion failure).
    m = jnp.max(logits, axis=-1, keepdims=True)
    e = jnp.exp(logits - m)
    s = jnp.sum(e, axis=-1, keepdims=True)
    out_ref[...] = e / s


def _choose_tile(B, num_tensorcores=1, target_tile=256):
    """Pick (batch_tile, padded_batch): single step for moderate B, ~256-row tiles
    for large B, >= num_tensorcores steps when there is enough work, and at most
    tile-1 (< 8 typical) padded rows."""
    b8 = _round_up(max(B, 1), 8)
    n_steps = max(num_tensorcores, _cdiv(b8, target_tile))
    n_steps = max(1, min(n_steps, b8 // 8))   # each step needs >= 8 real rows
    tb = _round_up(_cdiv(b8, n_steps), 8)
    b_pad = tb * _cdiv(b8, tb)
    return tb, b_pad


def _build_call(tb, b_pad, n_states, out_pad, single_buffer_weights):
    grid = (b_pad // tb,)

    def const(shape):
        # Weights/biases are VMEM-resident across grid steps (constant index_map);
        # single-buffer them when supported to save ~0.7 MB of dead VMEM.
        if single_buffer_weights:
            return pl.BlockSpec(shape, lambda i: (0, 0), pipeline_mode=pl.Buffered(1))
        return pl.BlockSpec(shape, lambda i: (0, 0))

    flops = 2 * b_pad * (n_states * HIDDEN + HIDDEN * HIDDEN + HIDDEN * out_pad)
    weight_bytes = 2 * (n_states * HIDDEN + HIDDEN * HIDDEN + HIDDEN * out_pad)  # bf16
    bias_bytes = 4 * (HIDDEN + HIDDEN + out_pad)
    bytes_accessed = 4 * b_pad * n_states + weight_bytes + bias_bytes + 4 * b_pad * out_pad
    vmem_limit = (16 << 20) if tb >= 256 else (8 << 20)

    return pl.pallas_call(
        policy_kernel,
        out_shape=jax.ShapeDtypeStruct((b_pad, out_pad), jnp.float32),
        grid=grid,
        in_specs=[
            pl.BlockSpec((tb, n_states), lambda i: (i, 0)),   # x streams per batch tile
            const((n_states, HIDDEN)), const((1, HIDDEN)),    # weights stay VMEM-resident
            const((HIDDEN, HIDDEN)),   const((1, HIDDEN)),
            const((HIDDEN, out_pad)),  const((1, out_pad)),
        ],
        out_specs=pl.BlockSpec((tb, out_pad), lambda i: (i, 0)),
        compiler_params=pltpu.CompilerParams(
            dimension_semantics=("parallel",),
            vmem_limit_bytes=vmem_limit,
        ),
        cost_estimate=pl.CostEstimate(
            flops=flops,
            transcendentals=b_pad * out_pad,
            bytes_accessed=bytes_accessed,
        ),
    )


def stochastic_policy_forward(x, packed, num_tensorcores=1):
    """x: (B, n_states) float32; packed: dict from pack_params().
    Returns (B, n_actions) float32 softmax probabilities.
    Pass num_tensorcores=2 on v7x to split the batch grid across both cores."""
    w1, b1, w2, b2, w3p, b3p = (packed["w1"], packed["b1"], packed["w2"],
                                packed["b2"], packed["w3"], packed["b3"])
    n_actions = packed["n_actions"]
    out_pad = packed["out_pad"]
    B, n_states = x.shape

    tb, b_pad = _choose_tile(B, num_tensorcores=num_tensorcores)
    if b_pad != B:
        x = jnp.pad(x, ((0, b_pad - B), (0, 0)))

    args = (x, w1, b1, w2, b2, w3p, b3p)
    try:
        out = _build_call(tb, b_pad, n_states, out_pad, single_buffer_weights=True)(*args)
        out = jax.block_until_ready(out)
    except Exception:
        # pipeline_mode / Buffered(1) unsupported on this jax version or backend.
        out = _build_call(tb, b_pad, n_states, out_pad, single_buffer_weights=False)(*args)

    return out[:B, :n_actions]


def init_params(key, n_states, n_actions):
    """Deterministic f32 init mirroring torch.nn.Linear (U(-1/sqrt(fan_in), 1/sqrt(fan_in)))."""
    keys = jax.random.split(key, 6)

    def linear(kw, kb, fan_in, fan_out):
        bound = 1.0 / jnp.sqrt(jnp.float32(fan_in))
        w = jax.random.uniform(kw, (fan_in, fan_out), jnp.float32, -bound, bound)
        b = jax.random.uniform(kb, (1, fan_out), jnp.float32, -bound, bound)
        return w, b

    w1, b1 = linear(keys[0], keys[1], n_states, HIDDEN)
    w2, b2 = linear(keys[2], keys[3], HIDDEN, HIDDEN)
    w3, b3 = linear(keys[4], keys[5], HIDDEN, n_actions)
    return {"w1": w1, "b1": b1, "w2": w2, "b2": b2, "w3": w3, "b3": b3}


def pack_params(params, n_actions):
    """Kernel-ready params: bf16 weights (halve HBM->VMEM weight bytes), f32 biases,
    fc3 padded to a multiple of LANE output columns (padded bias = -1e30 -> prob 0)."""
    out_pad = _round_up(n_actions, LANE)
    pad = out_pad - n_actions
    w3p = jnp.pad(params["w3"], ((0, 0), (0, pad)))
    b3p = jnp.pad(params["b3"], ((0, 0), (0, pad)), constant_values=NEG_INF)
    return {
        "w1": params["w1"].astype(jnp.bfloat16),
        "b1": params["b1"],
        "w2": params["w2"].astype(jnp.bfloat16),
        "b2": params["b2"],
        "w3": w3p.astype(jnp.bfloat16),
        "b3": b3p,
        "n_actions": n_actions,
        "out_pad": out_pad,
    }


def reference_forward(x, params):
    """Plain-JAX reference mimicking the kernel's bf16-operand / f32-accumulate arithmetic."""
    h1 = jnp.dot(x.astype(jnp.bfloat16), params["w1"].astype(jnp.bfloat16),
                 preferred_element_type=jnp.float32) + params["b1"]
    h1 = jnp.maximum(h1, 0.0)
    h2 = jnp.dot(h1.astype(jnp.bfloat16), params["w2"].astype(jnp.bfloat16),
                 preferred_element_type=jnp.float32) + params["b2"]
    h2 = jnp.maximum(h2, 0.0)
    logits = jnp.dot(h2.astype(jnp.bfloat16), params["w3"].astype(jnp.bfloat16),
                     preferred_element_type=jnp.float32) + params["b3"]
    return jax.nn.softmax(logits, axis=1)


# TODO(synk): selectAction's Categorical sampling / log_prob is host-side control
# logic around the forward pass and is intentionally not part of the kernel.

if __name__ == "__main__":
    key = jax.random.PRNGKey(0)
    k_params, k_x = jax.random.split(key)

    batch, n_states, n_actions = 2, 32, 8
    params = init_params(k_params, n_states, n_actions)
    packed = pack_params(params, n_actions)
    x = jax.random.normal(k_x, (batch, n_states), jnp.float32)

    probs = jax.block_until_ready(stochastic_policy_forward(x, packed))

    # sanity: shape and softmax rows summing to 1 (exact normalization)
    assert probs.shape == (batch, n_actions)
    assert jnp.allclose(jnp.sum(probs, axis=1), 1.0, atol=1e-3)

    # reference check (same bf16 weight quantization as the kernel)
    ref = reference_forward(x, params)
    assert jnp.allclose(probs, ref, atol=2e-3, rtol=2e-3)

    print("KERNEL_OK")
</pallas_src>

<mosaic_0001>
module attributes {stable_mosaic.version = 11 : i64} {
  func.func @policy_kernel(%arg0: i32, %arg1: memref<8x32xf32, #tpu.memory_space<vmem>>, %arg2: memref<32x512xbf16, #tpu.memory_space<vmem>>, %arg3: memref<1x512xf32, #tpu.memory_space<vmem>>, %arg4: memref<512x512xbf16, #tpu.memory_space<vmem>>, %arg5: memref<1x512xf32, #tpu.memory_space<vmem>>, %arg6: memref<512x128xbf16, #tpu.memory_space<vmem>>, %arg7: memref<1x128xf32, #tpu.memory_space<vmem>>, %arg8: memref<8x128xf32, #tpu.memory_space<vmem>>) attributes {dimension_semantics = [#tpu.dimension_semantics<parallel>], iteration_bounds = array<i64: 1>, scalar_prefetch = 0 : i64, scratch_operands = 0 : i64, tpu.core_type = #tpu.core_type<tc>, window_params = [{transform_indices = @transform_0, window_bounds = array<i64: 8, 32>}, {pipeline_mode = #tpu.pipeline_mode<synchronous>, transform_indices = @transform_1, window_bounds = array<i64: 32, 512>}, {pipeline_mode = #tpu.pipeline_mode<synchronous>, transform_indices = @transform_2, window_bounds = array<i64: 1, 512>}, {pipeline_mode = #tpu.pipeline_mode<synchronous>, transform_indices = @transform_3, window_bounds = array<i64: 512, 512>}, {pipeline_mode = #tpu.pipeline_mode<synchronous>, transform_indices = @transform_4, window_bounds = array<i64: 1, 512>}, {pipeline_mode = #tpu.pipeline_mode<synchronous>, transform_indices = @transform_5, window_bounds = array<i64: 512, 128>}, {pipeline_mode = #tpu.pipeline_mode<synchronous>, transform_indices = @transform_6, window_bounds = array<i64: 1, 128>}, {transform_indices = @transform_7, window_bounds = array<i64: 8, 128>}]} {
    %c0 = arith.constant 0 : index
    %c0_0 = arith.constant 0 : index
    %0 = vector.load %arg1[%c0, %c0_0] : memref<8x32xf32, #tpu.memory_space<vmem>>, vector<8x32xf32>
    %1 = arith.truncf %0 : vector<8x32xf32> to vector<8x32xbf16>
    %c0_1 = arith.constant 0 : index
    %c0_2 = arith.constant 0 : index
    %2 = vector.load %arg2[%c0_1, %c0_2] : memref<32x512xbf16, #tpu.memory_space<vmem>>, vector<32x512xbf16>
    %cst = arith.constant dense<0.000000e+00> : vector<8x512xf32>
    %3 = tpu.matmul %1, %2, %cst {dimension_numbers = #tpu.dot_dimension_numbers<[1], [0], [0], [1], [0, 0, 1, 1], [], []>} : vector<8x32xbf16>, vector<32x512xbf16>, vector<8x512xf32> -> vector<8x512xf32>
    %c0_3 = arith.constant 0 : index
    %c0_4 = arith.constant 0 : index
    %4 = vector.load %arg3[%c0_3, %c0_4] : memref<1x512xf32, #tpu.memory_space<vmem>>, vector<1x512xf32>
    %5 = vector.broadcast %4 : vector<1x512xf32> to vector<8x512xf32>
    %6 = arith.addf %3, %5 : vector<8x512xf32>
    %cst_5 = arith.constant 0.000000e+00 : f32
    %7 = vector.broadcast %cst_5 : f32 to vector<8x512xf32>
    %8 = arith.maximumf %6, %7 : vector<8x512xf32>
    %9 = arith.truncf %8 : vector<8x512xf32> to vector<8x512xbf16>
    %c0_6 = arith.constant 0 : index
    %c0_7 = arith.constant 0 : index
    %10 = vector.load %arg4[%c0_6, %c0_7] : memref<512x512xbf16, #tpu.memory_space<vmem>>, vector<512x512xbf16>
    %cst_8 = arith.constant dense<0.000000e+00> : vector<8x512xf32>
    %11 = tpu.matmul %9, %10, %cst_8 {dimension_numbers = #tpu.dot_dimension_numbers<[1], [0], [0], [1], [0, 0, 1, 1], [], []>} : vector<8x512xbf16>, vector<512x512xbf16>, vector<8x512xf32> -> vector<8x512xf32>
    %c0_9 = arith.constant 0 : index
    %c0_10 = arith.constant 0 : index
    %12 = vector.load %arg5[%c0_9, %c0_10] : memref<1x512xf32, #tpu.memory_space<vmem>>, vector<1x512xf32>
    %13 = vector.broadcast %12 : vector<1x512xf32> to vector<8x512xf32>
    %14 = arith.addf %11, %13 : vector<8x512xf32>
    %cst_11 = arith.constant 0.000000e+00 : f32
    %15 = vector.broadcast %cst_11 : f32 to vector<8x512xf32>
    %16 = arith.maximumf %14, %15 : vector<8x512xf32>
    %17 = arith.truncf %16 : vector<8x512xf32> to vector<8x512xbf16>
    %c0_12 = arith.constant 0 : index
    %c0_13 = arith.constant 0 : index
    %18 = vector.load %arg6[%c0_12, %c0_13] : memref<512x128xbf16, #tpu.memory_space<vmem>>, vector<512x128xbf16>
    %cst_14 = arith.constant dense<0.000000e+00> : vector<8x128xf32>
    %19 = tpu.matmul %17, %18, %cst_14 {dimension_numbers = #tpu.dot_dimension_numbers<[1], [0], [0], [1], [0, 0, 1, 1], [], []>} : vector<8x512xbf16>, vector<512x128xbf16>, vector<8x128xf32> -> vector<8x128xf32>
    %c0_15 = arith.constant 0 : index
    %c0_16 = arith.constant 0 : index
    %20 = vector.load %arg7[%c0_15, %c0_16] : memref<1x128xf32, #tpu.memory_space<vmem>>, vector<1x128xf32>
    %21 = vector.broadcast %20 : vector<1x128xf32> to vector<8x128xf32>
    %22 = arith.addf %19, %21 : vector<8x128xf32>
    %cst_17 = arith.constant dense<0xFF800000> : vector<8xf32>
    %23 = vector.multi_reduction <maximumf>, %22, %cst_17 [1] : vector<8x128xf32> to vector<8xf32>
    %24 = vector.shape_cast %23 : vector<8xf32> to vector<8x1xf32>
    %25 = vector.broadcast %24 : vector<8x1xf32> to vector<8x128xf32>
    %26 = arith.subf %22, %25 : vector<8x128xf32>
    %27 = math.exp %26 : vector<8x128xf32>
    %cst_18 = arith.constant dense<0.000000e+00> : vector<8xf32>
    %28 = vector.multi_reduction <add>, %27, %cst_18 [1] : vector<8x128xf32> to vector<8xf32>
    %29 = vector.shape_cast %28 : vector<8xf32> to vector<8x1xf32>
    %30 = vector.broadcast %29 : vector<8x1xf32> to vector<8x128xf32>
    %31 = arith.divf %27, %30 : vector<8x128xf32>
    %c0_19 = arith.constant 0 : index
    %c0_20 = arith.constant 0 : index
    %32 = vector.load %arg8[%c0_19, %c0_20] : memref<8x128xf32, #tpu.memory_space<vmem>>, vector<8x128xf32>
    tpu.vector_store %arg8[%c0_19, %c0_20], %31 {strides = array<i32>} : memref<8x128xf32, #tpu.memory_space<vmem>>, vector<8x128xf32>,
    return
  }
  func.func @transform_0(%arg0: i32) -> (i32, i32) {
    %c0_i32 = arith.constant 0 : i32
    %c0_i32_0 = arith.constant 0 : i32
    return %arg0, %c0_i32 : i32, i32
  }
  func.func @transform_1(%arg0: i32) -> (i32, i32) {
    %c0_i32 = arith.constant 0 : i32
    %c0_i32_0 = arith.constant 0 : i32
    %c0_i32_1 = arith.constant 0 : i32
    return %c0_i32, %c0_i32_0 : i32, i32
  }
  func.func @transform_2(%arg0: i32) -> (i32, i32) {
    %c0_i32 = arith.constant 0 : i32
    %c0_i32_0 = arith.constant 0 : i32
    %c0_i32_1 = arith.constant 0 : i32
    return %c0_i32, %c0_i32_0 : i32, i32
  }
  func.func @transform_3(%arg0: i32) -> (i32, i32) {
    %c0_i32 = arith.constant 0 : i32
    %c0_i32_0 = arith.constant 0 : i32
    %c0_i32_1 = arith.constant 0 : i32
    return %c0_i32, %c0_i32_0 : i32, i32
  }
  func.func @transform_4(%arg0: i32) -> (i32, i32) {
    %c0_i32 = arith.constant 0 : i32
    %c0_i32_0 = arith.constant 0 : i32
    %c0_i32_1 = arith.constant 0 : i32
    return %c0_i32, %c0_i32_0 : i32, i32
  }
  func.func @transform_5(%arg0: i32) -> (i32, i32) {
    %c0_i32 = arith.constant 0 : i32
    %c0_i32_0 = arith.constant 0 : i32
    %c0_i32_1 = arith.constant 0 : i32
    return %c0_i32, %c0_i32_0 : i32, i32
  }
  func.func @transform_6(%arg0: i32) -> (i32, i32) {
    %c0_i32 = arith.constant 0 : i32
    %c0_i32_0 = arith.constant 0 : i32
    %c0_i32_1 = arith.constant 0 : i32
    return %c0_i32, %c0_i32_0 : i32, i32
  }
  func.func @transform_7(%arg0: i32) -> (i32, i32) {
    %c0_i32 = arith.constant 0 : i32
    %c0_i32_0 = arith.constant 0 : i32
    return %arg0, %c0_i32 : i32, i32
  }
}

module attributes {stable_mosaic.version = 11 : i64} {
  func.func @policy_kernel(%arg0: i32, %arg1: memref<8x32xf32, #tpu.memory_space<vmem>>, %arg2: memref<32x512xbf16, #tpu.memory_space<vmem>>, %arg3: memref<1x512xf32, #tpu.memory_space<vmem>>, %arg4: memref<512x512xbf16, #tpu.memory_space<vmem>>, %arg5: memref<1x512xf32, #tpu.memory_space<vmem>>, %arg6: memref<512x128xbf16, #tpu.memory_space<vmem>>, %arg7: memref<1x128xf32, #tpu.memory_space<vmem>>, %arg8: memref<8x128xf32, #tpu.memory_space<vmem>>) attributes {dimension_semantics = [#tpu.dimension_semantics<parallel>], iteration_bounds = array<i64: 1>, scalar_prefetch = 0 : i64, scratch_operands = 0 : i64, tpu.core_type = #tpu.core_type<tc>, window_params = [{transform_indices = @transform_0, window_bounds = array<i64: 8, 32>}, {pipeline_mode = #tpu.pipeline_mode<synchronous>, transform_indices = @transform_1, window_bounds = array<i64: 32, 512>}, {pipeline_mode = #tpu.pipeline_mode<synchronous>, transform_indices = @transform_2, window_bounds = array<i64: 1, 512>}, {pipeline_mode = #tpu.pipeline_mode<synchronous>, transform_indices = @transform_3, window_bounds = array<i64: 512, 512>}, {pipeline_mode = #tpu.pipeline_mode<synchronous>, transform_indices = @transform_4, window_bounds = array<i64: 1, 512>}, {pipeline_mode = #tpu.pipeline_mode<synchronous>, transform_indices = @transform_5, window_bounds = array<i64: 512, 128>}, {pipeline_mode = #tpu.pipeline_mode<synchronous>, transform_indices = @transform_6, window_bounds = array<i64: 1, 128>}, {transform_indices = @transform_7, window_bounds = array<i64: 8, 128>}]} {
    %c0 = arith.constant 0 : index
    %c0_0 = arith.constant 0 : index
    %0 = vector.load %arg1[%c0, %c0_0] : memref<8x32xf32, #tpu.memory_space<vmem>>, vector<8x32xf32>
    %1 = arith.truncf %0 : vector<8x32xf32> to vector<8x32xbf16>
    %c0_1 = arith.constant 0 : index
    %c0_2 = arith.constant 0 : index
    %2 = vector.load %arg2[%c0_1, %c0_2] : memref<32x512xbf16, #tpu.memory_space<vmem>>, vector<32x512xbf16>
    %cst = arith.constant dense<0.000000e+00> : vector<8x512xf32>
    %3 = tpu.matmul %1, %2, %cst {dimension_numbers = #tpu.dot_dimension_numbers<[1], [0], [0], [1], [0, 0, 1, 1], [], []>} : vector<8x32xbf16>, vector<32x512xbf16>, vector<8x512xf32> -> vector<8x512xf32>
    %c0_3 = arith.constant 0 : index
    %c0_4 = arith.constant 0 : index
    %4 = vector.load %arg3[%c0_3, %c0_4] : memref<1x512xf32, #tpu.memory_space<vmem>>, vector<1x512xf32>
    %5 = vector.broadcast %4 : vector<1x512xf32> to vector<8x512xf32>
    %6 = arith.addf %3, %5 : vector<8x512xf32>
    %cst_5 = arith.constant 0.000000e+00 : f32
    %7 = vector.broadcast %cst_5 : f32 to vector<8x512xf32>
    %8 = arith.maximumf %6, %7 : vector<8x512xf32>
    %9 = arith.truncf %8 : vector<8x512xf32> to vector<8x512xbf16>
    %c0_6 = arith.constant 0 : index
    %c0_7 = arith.constant 0 : index
    %10 = vector.load %arg4[%c0_6, %c0_7] : memref<512x512xbf16, #tpu.memory_space<vmem>>, vector<512x512xbf16>
    %cst_8 = arith.constant dense<0.000000e+00> : vector<8x512xf32>
    %11 = tpu.matmul %9, %10, %cst_8 {dimension_numbers = #tpu.dot_dimension_numbers<[1], [0], [0], [1], [0, 0, 1, 1], [], []>} : vector<8x512xbf16>, vector<512x512xbf16>, vector<8x512xf32> -> vector<8x512xf32>
    %c0_9 = arith.constant 0 : index
    %c0_10 = arith.constant 0 : index
    %12 = vector.load %arg5[%c0_9, %c0_10] : memref<1x512xf32, #tpu.memory_space<vmem>>, vector<1x512xf32>
    %13 = vector.broadcast %12 : vector<1x512xf32> to vector<8x512xf32>
    %14 = arith.addf %11, %13 : vector<8x512xf32>
    %cst_11 = arith.constant 0.000000e+00 : f32
    %15 = vector.broadcast %cst_11 : f32 to vector<8x512xf32>
    %16 = arith.maximumf %14, %15 : vector<8x512xf32>
    %17 = arith.truncf %16 : vector<8x512xf32> to vector<8x512xbf16>
    %c0_12 = arith.constant 0 : index
    %c0_13 = arith.constant 0 : index
    %18 = vector.load %arg6[%c0_12, %c0_13] : memref<512x128xbf16, #tpu.memory_space<vmem>>, vector<512x128xbf16>
    %cst_14 = arith.constant dense<0.000000e+00> : vector<8x128xf32>
    %19 = tpu.matmul %17, %18, %cst_14 {dimension_numbers = #tpu.dot_dimension_numbers<[1], [0], [0], [1], [0, 0, 1, 1], [], []>} : vector<8x512xbf16>, vector<512x128xbf16>, vector<8x128xf32> -> vector<8x128xf32>
    %c0_15 = arith.constant 0 : index
    %c0_16 = arith.constant 0 : index
    %20 = vector.load %arg7[%c0_15, %c0_16] : memref<1x128xf32, #tpu.memory_space<vmem>>, vector<1x128xf32>
    %21 = vector.broadcast %20 : vector<1x128xf32> to vector<8x128xf32>
    %22 = arith.addf %19, %21 : vector<8x128xf32>
    %cst_17 = arith.constant dense<0xFF800000> : vector<8xf32>
    %23 = vector.multi_reduction <maximumf>, %22, %cst_17 [1] : vector<8x128xf32> to vector<8xf32>
    %24 = vector.shape_cast %23 : vector<8xf32> to vector<8x1xf32>
    %25 = vector.broadcast %24 : vector<8x1xf32> to vector<8x128xf32>
    %26 = arith.subf %22, %25 : vector<8x128xf32>
    %27 = math.exp %26 : vector<8x128xf32>
    %cst_18 = arith.constant dense<0.000000e+00> : vector<8xf32>
    %28 = vector.multi_reduction <add>, %27, %cst_18 [1] : vector<8x128xf32> to vector<8xf32>
    %29 = vector.shape_cast %28 : vector<8xf32> to vector<8x1xf32>
    %30 = vector.broadcast %29 : vector<8x1xf32> to vector<8x128xf32>
    %31 = arith.divf %27, %30 : vector<8x128xf32>
    %c0_19 = arith.constant 0 : index
    %c0_20 = arith.constant 0 : index
    %32 = vector.load %arg8[%c0_19, %c0_20] : memref<8x128xf32, #tpu.memory_space<vmem>>, vector<8x128xf32>
    tpu.vector_store %arg8[%c0_19, %c0_20], %31 {strides = array<i32>} : memref<8x128xf32, #tpu.memory_space<vmem>>, vector<8x128xf32>,
    return
  }
  func.func @transform_0(%arg0: i32) -> (i32, i32) {
    %c0_i32 = arith.constant 0 : i32
    %c0_i32_0 = arith.constant 0 : i32
    return %arg0, %c0_i32 : i32, i32
  }
  func.func @transform_1(%arg0: i32) -> (i32, i32) {
    %c0_i32 = arith.constant 0 : i32
    %c0_i32_0 = arith.constant 0 : i32
    %c0_i32_1 = arith.constant 0 : i32
    return %c0_i32, %c0_i32_0 : i32, i32
  }
  func.func @transform_2(%arg0: i32) -> (i32, i32) {
    %c0_i32 = arith.constant 0 : i32
    %c0_i32_0 = arith.constant 0 : i32
    %c0_i32_1 = arith.constant 0 : i32
    return %c0_i32, %c0_i32_0 : i32, i32
  }
  func.func @transform_3(%arg0: i32) -> (i32, i32) {
    %c0_i32 = arith.constant 0 : i32
    %c0_i32_0 = arith.constant 0 : i32
    %c0_i32_1 = arith.constant 0 : i32
    return %c0_i32, %c0_i32_0 : i32, i32
  }
  func.func @transform_4(%arg0: i32) -> (i32, i32) {
    %c0_i32 = arith.constant 0 : i32
    %c0_i32_0 = arith.constant 0 : i32
    %c0_i32_1 = arith.constant 0 : i32
    return %c0_i32, %c0_i32_0 : i32, i32
  }
  func.func @transform_5(%arg0: i32) -> (i32, i32) {
    %c0_i32 = arith.constant 0 : i32
    %c0_i32_0 = arith.constant 0 : i32
    %c0_i32_1 = arith.constant 0 : i32
    return %c0_i32, %c0_i32_0 : i32, i32
  }
  func.func @transform_6(%arg0: i32) -> (i32, i32) {
    %c0_i32 = arith.constant 0 : i32
    %c0_i32_0 = arith.constant 0 : i32
    %c0_i32_1 = arith.constant 0 : i32
    return %c0_i32, %c0_i32_0 : i32, i32
  }
  func.func @transform_7(%arg0: i32) -> (i32, i32) {
    %c0_i32 = arith.constant 0 : i32
    %c0_i32_0 = arith.constant 0 : i32
    return %arg0, %c0_i32 : i32, i32
  }
}

</mosaic_0001>

<bundles_post_ra>
// kernel: tpu_custom_call.1
= control target key start
LH: loop header
LB: loop body
LE: loop exit
PB: predicated region body
PF: predicated region fallthrough
CT: control target
= control target key end

     0   :  { %12 = vsyncpa [#allocation3], 0  ;;  %s2736_s0 = inlined_call_operand.hbm [shape: f32[8,32], index: 0, kind: input, shape index: {}]   ;;  %s2737_s1 = inlined_call_operand.hbm [shape: bf16[32,512], index: 1, kind: input, shape index: {}]   ;;  %s2738_s2 = inlined_call_operand.hbm [shape: f32[1,512], index: 2, kind: input, shape index: {}]   ;;  %s2739_s3 = inlined_call_operand.hbm [shape: bf16[512,512], index: 3, kind: input, shape index: {}]   ;;  %s2740_s4 = inlined_call_operand.hbm [shape: f32[1,512], index: 4, kind: input, shape index: {}]   ;;  %s2741_s5 = inlined_call_operand.hbm [shape: bf16[512,128], index: 5, kind: input, shape index: {}]   ;;  %s2742_s6 = inlined_call_operand.vmem [shape: f32[1,128], index: 6, kind: input, shape index: {}]   ;;  %s2743_s7 = inlined_call_operand.hbm [shape: f32[8,128], index: 7, kind: output, shape index: {}]  }
   0x1   :  { %13 = vsyncpa [#allocation6], 0 }
   0x2   :  { %14 = vsyncpa [#allocation9], 0 }
   0x3   :  { %15 = vsyncpa [#allocation12], 0  ;;  %s32_s26 = sshll.u32 %s2737_s1, 4  ;;  %s33_s26 = int_to_ptr.hbm [resolvable:$true] %s32_s26 }
   0x4   :  { %16 = vsyncpa [#allocation4], 0  ;;  %s2627_s27 = smov [#allocation5]   ;;  %s56_s8 = sshll.u32 %s2739_s3, 4  ;;  %s57_s8 = int_to_ptr.hbm [resolvable:$true] %s56_s8 }
   0x5   :  { %s34_s28 = sshll.u32 %s2627_s27, 4  ;;  %s2628_s9 = smov 256   ;;  %s35_s28 = int_to_ptr.vmem [resolvable:$true] %s34_s28 }
   0x6   :  { %s2629_s10 = smov 16   ;;  %s2630_s11 = smov [#allocation8]  }
   0x7   :  { %40 = dma.hbm_to_vmem [thread:$0]  %s33_s26, 1024, %s35_s28, [#allocation6], %s2628_s9, %s2628_s9, %s2629_s10  }
   0x8   :  { %s58_s12 = sshll.u32 %s2630_s11, 4  ;;  %s22_s15 = sshll.u32 %s2736_s0, 4  ;;  %s59_s12 = int_to_ptr.vmem [resolvable:$true] %s58_s12  ;;  %s23_s15 = int_to_ptr.hbm [resolvable:$true] %s22_s15 }
   0x9   :  { %64 = dma.hbm_to_vmem [thread:$0]  %s57_s8, 16384, %s59_s12, [#allocation9], %s2628_s9, %s2628_s9, %s2629_s10  }
   0xa   :  { %s46_s17 = sshll.u32 %s2738_s2, 4  ;;  %s2631_s18 = smov [#allocation2]   ;;  %s47_s17 = int_to_ptr.hbm [resolvable:$true] %s46_s17 }
   0xb   :  { %s24_s19 = sshll.u32 %s2631_s18, 4  ;;  %s2632_s3 = smov [#allocation7]   ;;  %s25_s19 = int_to_ptr.vmem [resolvable:$true] %s24_s19 }
   0xc   :  { %27 = dma.hbm_to_vmem [thread:$0]  %s23_s15, 128, %s25_s19, [#allocation3]  }
   0xd   :  { %s48_s20 = sshll.u32 %s2632_s3, 4  ;;  %s70_s23 = sshll.u32 %s2740_s4, 4  ;;  %s49_s20 = int_to_ptr.vmem [resolvable:$true] %s48_s20  ;;  %s71_s23 = int_to_ptr.hbm [resolvable:$true] %s70_s23 }
   0xe   :  { %51 = dma.hbm_to_vmem [thread:$0]  %s47_s17, 64, %s49_s20, [#allocation6]  }
   0xf   :  { %s80_s25 = sshll.u32 %s2741_s5, 4  ;;  %s2633_s26 = smov [#allocation10]   ;;  %s81_s25 = int_to_ptr.hbm [resolvable:$true] %s80_s25 }
  0x10   :  { %s72_s2 = sshll.u32 %s2633_s26, 4  ;;  %s2634_s27 = smov [#allocation11]   ;;  %s73_s2 = int_to_ptr.vmem [resolvable:$true] %s72_s2 }
  0x11   :  { %75 = dma.hbm_to_vmem [thread:$0]  %s71_s23, 64, %s73_s2, [#allocation9]  }
  0x12   :  { %s82_s28 = sshll.u32 %s2634_s27, 4  ;;  %s2635_s29 = smov 64   ;;  %s83_s28 = int_to_ptr.vmem [resolvable:$true] %s82_s28 }
  0x13   :  { %s2636_s30 = smov 4  }
  0x14   :  { %88 = dma.hbm_to_vmem [thread:$0]  %s81_s25, 4096, %s83_s28, [#allocation12], %s2635_s29, %s2635_s29, %s2636_s30  }
  0x15   :  { %2617 = dma.done.wait [#allocation3], 128  }
  0x16   :  { %2618 = vsyncadd [#allocation3], 4294967168 }
  0x17   :  { %2619 = dma.done.wait [#allocation6], 1088  }
  0x18   :  { %2620 = vsyncadd [#allocation6], 4294966208 }
  0x19   :  { %2621 = dma.done.wait [#allocation9], 16448  }
  0x1a   :  { %2622 = vsyncadd [#allocation9], 4294950848 }
  0x1b   :  { %2623 = dma.done.wait [#allocation12], 4096  }
  0x1c   :  { %2624 = vsyncadd [#allocation12], 4294963200  ;;  %v1607_v0 = vld [vmem:[#allocation5 + $0x20] sm:$0xf]  ;;  %v2271_v1 = vld [vmem:[#allocation5 + $0x2c] sm:$0xf0] }
  0x1d   :  { %v2269_v2 = vld [vmem:[#allocation5 + $0x24] sm:$0xf]  ;;  %v1608_v3 = vor.u32 %v2271_v1, %v1607_v0  ;;  %v1609_v4 = vld [vmem:[#allocation5 + $0x30] sm:$0xf0]  ;;  %v1615_v5 = vld [vmem:[#allocation5 + $0x28] sm:$0xf] }
  0x1e   :  { %v2272_v6 = vld [vmem:[#allocation5 + $0x34] sm:$0xf0]  ;;  %v1612_v7 = vor.u32 %v2269_v2, %v1609_v4  ;;  %v2270_v9 = vld [vmem:[#allocation5 + $0x2c] sm:$0xf]  ;;  %v1617_v10 = vld [vmem:[#allocation5 + $0x38] sm:$0xf0] }
  0x1f   :  { %v1616_v8 = vor.u32 %v2272_v6, %v1615_v5  ;;  %v1591_v11 = vld [vmem:[#allocation5] sm:$0xf]  ;;  %186 = vmatpush.bf16.msra.mxu0 %v1608_v3  ;;  %v1620_v12 = vor.u32 %v2270_v9, %v1617_v10  ;;  %v2267_v13 = vld [vmem:[#allocation5 + $0xc] sm:$0xf0]  ;;  %v2265_v14 = vld [vmem:[#allocation5 + $0x4] sm:$0xf] }
  0x20   :  { %v1593_v15 = vld [vmem:[#allocation5 + $0x10] sm:$0xf0]  ;;  %199 = vmatpush.bf16.msra.mxu1 %v1612_v7  ;;  %v1592_v16 = vor.u32 %v2267_v13, %v1591_v11  ;;  %v1599_v18 = vld [vmem:[#allocation5 + $0x8] sm:$0xf]  ;;  %v2268_v19 = vld [vmem:[#allocation5 + $0x14] sm:$0xf0] }
  0x21   :  { %212 = vmatpush.bf16.msra.mxu2 %v1616_v8  ;;  %v1596_v17 = vor.u32 %v2265_v14, %v1593_v15  ;;  %v2266_v20 = vld [vmem:[#allocation5 + $0xc] sm:$0xf]  ;;  %225 = vmatpush.bf16.msra.mxu3 %v1620_v12  ;;  %v1600_v21 = vor.u32 %v2268_v19, %v1599_v18  ;;  %v1601_v22 = vld [vmem:[#allocation5 + $0x18] sm:$0xf0]  ;;  %vm176_vm0 = vcmask 261120   ;;  %s1576_s11 = sshll.u32 %s2743_s7, 4  ;;  %s1577_s11 = int_to_ptr.hbm [resolvable:$true] %s1576_s11 }
  0x22   :  { %v116_v23 = vld [vmem:[#allocation2] sm:$0xff]  ;;  %v1739_v24 = vld [vmem:[#allocation8 + $0xe0] sm:$0xf]  ;;  %v1604_v25 = vor.u32 %v2266_v20, %v1601_v22  ;;  %v2303_v27 = vld [vmem:[#allocation8 + $0xec] sm:$0xf0] }
  0x23   :  { %v117_v26 = vpack.c.bf16 %v116_v23, %v116_v23  ;;  %v1867_v28 = vld [vmem:[#allocation8 + $0x1e0] sm:$0xf]  ;;  %v2335_v29 = vld [vmem:[#allocation8 + $0x1ec] sm:$0xf0]  ;;  %187 = vmatpush.bf16.msra.mxu0 %v1592_v16  ;;  %v1740_v30 = vor.u32 %v2303_v27, %v1739_v24 }
  0x24   :  { %v1868_v31 = vor.u32 %v2335_v29, %v1867_v28  ;;  %v1723_v32 = vld [vmem:[#allocation8 + $0xc0] sm:$0xf]  ;;  %v2299_v33 = vld [vmem:[#allocation8 + $0xcc] sm:$0xf0]  ;;  %200 = vmatpush.bf16.msra.mxu1 %v1596_v17 }
  0x25   :  { %v1851_v34 = vld [vmem:[#allocation8 + $0x1c0] sm:$0xf]  ;;  %213 = vmatpush.bf16.msra.mxu2 %v1600_v21  ;;  %v2331_v35 = vld [vmem:[#allocation8 + $0x1cc] sm:$0xf0]  ;;  %226 = vmatpush.bf16.msra.mxu3 %v1604_v25  ;;  %v1724_v38 = vor.u32 %v2299_v33, %v1723_v32 }
  0x26   :  { %v1995_v36 = vld [vmem:[#allocation8 + $0x2e0] sm:$0xf]  ;;  %v2367_v37 = vld [vmem:[#allocation8 + $0x2ec] sm:$0xf0]  ;;  %1621 = vmatmul.msk.bf16.vlgmr.msra.gmra.mxu0 %vm176_vm0, %v117_v26  ;;  %v1852_v43 = vor.u32 %v2331_v35, %v1851_v34 }
  0x27   :  { %1018 = vmatpush.bf16.msrb.mxu0 %v1740_v30  ;;  %v1996_v39 = vor.u32 %v2367_v37, %v1995_v36  ;;  %v2123_v40 = vld [vmem:[#allocation8 + $0x3e0] sm:$0xf]  ;;  %v2399_v41 = vld [vmem:[#allocation8 + $0x3ec] sm:$0xf0]  ;;  %1622 = vmatmul.msk.bf16.vlgmr.msra.gmra.mxu1 %vm176_vm0, %v117_v26 }
  0x28   :  { %v1707_v42 = vld [vmem:[#allocation8 + $0xa0] sm:$0xf]  ;;  %1031 = vmatpush.bf16.msrb.mxu1 %v1868_v31  ;;  %v2124_v44 = vor.u32 %v2399_v41, %v2123_v40  ;;  %v2295_v45 = vld [vmem:[#allocation8 + $0xac] sm:$0xf0]  ;;  %1623 = vmatmul.msk.bf16.vlgmr.msra.gmra.mxu2 %vm176_vm0, %v117_v26 }
  0x29   :  { %v1835_v46 = vld [vmem:[#allocation8 + $0x1a0] sm:$0xf]  ;;  %v2327_v47 = vld [vmem:[#allocation8 + $0x1ac] sm:$0xf0]  ;;  %1624 = vmatmul.msk.bf16.vlgmr.msra.gmra.mxu3 %vm176_vm0, %v117_v26  ;;  %1044 = vmatpush.bf16.msrb.mxu2 %v1996_v39  ;;  %v1708_v53 = vor.u32 %v2295_v45, %v1707_v42 }
  0x2a   :  { %v1979_v48 = vld [vmem:[#allocation8 + $0x2c0] sm:$0xf]  ;;  %v2363_v49 = vld [vmem:[#allocation8 + $0x2cc] sm:$0xf0]  ;;  %1057 = vmatpush.bf16.msrb.mxu3 %v2124_v44  ;;  %v1836_v58 = vor.u32 %v2327_v47, %v1835_v46 }
  0x2b   :  { %v2107_v50 = vld [vmem:[#allocation8 + $0x3c0] sm:$0xf]  ;;  %v1980_v51 = vor.u32 %v2363_v49, %v1979_v48  ;;  %v2395_v52 = vld [vmem:[#allocation8 + $0x3cc] sm:$0xf0]  ;;  %1019 = vmatpush.bf16.msrb.mxu0 %v1724_v38  ;;  %v2301_v48 = vld [vmem:[#allocation8 + $0xe4] sm:$0xf] }
  0x2c   :  { %v2108_v54 = vor.u32 %v2395_v52, %v2107_v50  ;;  %v1691_v55 = vld [vmem:[#allocation8 + $0x80] sm:$0xf]  ;;  %v2291_v56 = vld [vmem:[#allocation8 + $0x8c] sm:$0xf0]  ;;  %1032 = vmatpush.bf16.msrb.mxu1 %v1852_v43  ;;  %v1741_v49 = vld [vmem:[#allocation8 + $0xf0] sm:$0xf0] }
  0x2d   :  { %v1963_v57 = vld [vmem:[#allocation8 + $0x2a0] sm:$0xf]  ;;  %v2359_v59 = vld [vmem:[#allocation8 + $0x2ac] sm:$0xf0]  ;;  %1045 = vmatpush.bf16.msrb.mxu2 %v1980_v51  ;;  %v1692_v1 = vor.u32 %v2291_v56, %v1691_v55  ;;  %v2333_v50 = vld [vmem:[#allocation8 + $0x1e4] sm:$0xf] }
  0x2e   :  { %v2091_v60 = vld [vmem:[#allocation8 + $0x3a0] sm:$0xf]  ;;  %v2391_v61 = vld [vmem:[#allocation8 + $0x3ac] sm:$0xf0]  ;;  %v1964_v0 = vor.u32 %v2359_v59, %v1963_v57  ;;  %1058 = vmatpush.bf16.msrb.mxu3 %v2108_v54  ;;  %v1869_v51 = vld [vmem:[#allocation8 + $0x1f0] sm:$0xf0] }
  0x2f   :  { %v1819_v62 = vld [vmem:[#allocation8 + $0x180] sm:$0xf]  ;;  %v2323_v63 = vld [vmem:[#allocation8 + $0x18c] sm:$0xf0]  ;;  %1020 = vmatpush.bf16.msrb.mxu0 %v1708_v53  ;;  %v2092_v2 = vor.u32 %v2391_v61, %v2091_v60  ;;  %v2297_v55 = vld [vmem:[#allocation8 + $0xc4] sm:$0xf]  ;;  %v1744_v60 = vor.u32 %v2301_v48, %v1741_v49 }
  0x30   :  { %v1675_v3 = vld [vmem:[#allocation8 + $0x60] sm:$0xf]  ;;  %v2355_v5 = vld [vmem:[#allocation8 + $0x28c] sm:$0xf0]  ;;  %1033 = vmatpush.bf16.msrb.mxu1 %v1836_v58  ;;  %v1820_v6 = vor.u32 %v2323_v63, %v1819_v62  ;;  %v2365_v62 = vld [vmem:[#allocation8 + $0x2e4] sm:$0xf] }
  0x31   :  { %v1947_v4 = vld [vmem:[#allocation8 + $0x280] sm:$0xf]  ;;  %v2287_v7 = vld [vmem:[#allocation8 + $0x6c] sm:$0xf0]  ;;  %1046 = vmatpush.bf16.msrb.mxu2 %v1964_v0  ;;  %v1997_v63 = vld [vmem:[#allocation8 + $0x2f0] sm:$0xf0]  ;;  %v1872_v0 = vor.u32 %v2333_v50, %v1869_v51 }
  0x32   :  { %v2075_v8 = vld [vmem:[#allocation8 + $0x380] sm:$0xf]  ;;  %v2387_v9 = vld [vmem:[#allocation8 + $0x38c] sm:$0xf0]  ;;  %v1948_v12 = vor.u32 %v2355_v5, %v1947_v4  ;;  %1059 = vmatpush.bf16.msrb.mxu3 %v2092_v2  ;;  %v1676_v13 = vor.u32 %v2287_v7, %v1675_v3  ;;  %v2397_v2 = vld [vmem:[#allocation8 + $0x3e4] sm:$0xf] }
  0x33   :  { %v1803_v10 = vld [vmem:[#allocation8 + $0x160] sm:$0xf]  ;;  %v2319_v11 = vld [vmem:[#allocation8 + $0x16c] sm:$0xf0]  ;;  %1021 = vmatpush.bf16.msrb.mxu0 %v1692_v1  ;;  %v2076_v14 = vor.u32 %v2387_v9, %v2075_v8  ;;  %v1725_v1 = vld [vmem:[#allocation8 + $0xd0] sm:$0xf0]  ;;  %v2000_v8 = vor.u32 %v2365_v62, %v1997_v63 }
  0x34   :  { %v1659_v15 = vld [vmem:[#allocation8 + $0x40] sm:$0xf]  ;;  %v2351_v17 = vld [vmem:[#allocation8 + $0x26c] sm:$0xf0]  ;;  %1034 = vmatpush.bf16.msrb.mxu1 %v1820_v6  ;;  %v1804_v18 = vor.u32 %v2319_v11, %v1803_v10  ;;  %v2125_v3 = vld [vmem:[#allocation8 + $0x3f0] sm:$0xf0]  ;;  %v1728_v9 = vor.u32 %v2297_v55, %v1725_v1 }
  0x35   :  { %v1931_v16 = vld [vmem:[#allocation8 + $0x260] sm:$0xf]  ;;  %v2283_v19 = vld [vmem:[#allocation8 + $0x4c] sm:$0xf0]  ;;  %1047 = vmatpush.bf16.msrb.mxu2 %v1948_v12  ;;  %v2329_v4 = vld [vmem:[#allocation8 + $0x1c4] sm:$0xf]  ;;  %v2128_v10 = vor.u32 %v2397_v2, %v2125_v3 }
  0x36   :  { %v2059_v20 = vld [vmem:[#allocation8 + $0x360] sm:$0xf]  ;;  %v2383_v21 = vld [vmem:[#allocation8 + $0x36c] sm:$0xf0]  ;;  %v1932_v24 = vor.u32 %v2351_v17, %v1931_v16  ;;  %1060 = vmatpush.bf16.msrb.mxu3 %v2076_v14  ;;  %v1660_v25 = vor.u32 %v2283_v19, %v1659_v15  ;;  %v1853_v5 = vld [vmem:[#allocation8 + $0x1d0] sm:$0xf0] }
  0x37   :  { %v1787_v22 = vld [vmem:[#allocation8 + $0x140] sm:$0xf]  ;;  %v2315_v23 = vld [vmem:[#allocation8 + $0x14c] sm:$0xf0]  ;;  %1022 = vmatpush.bf16.msrb.mxu0 %v1676_v13  ;;  %v2060_v26 = vor.u32 %v2383_v21, %v2059_v20  ;;  %v2293_v11 = vld [vmem:[#allocation8 + $0xa4] sm:$0xf]  ;;  %v1856_v14 = vor.u32 %v2329_v4, %v1853_v5 }
  0x38   :  { %v1643_v27 = vld [vmem:[#allocation8 + $0x20] sm:$0xf]  ;;  %v2347_v29 = vld [vmem:[#allocation8 + $0x24c] sm:$0xf0]  ;;  %1035 = vmatpush.bf16.msrb.mxu1 %v1804_v18  ;;  %v1788_v30 = vor.u32 %v2315_v23, %v1787_v22  ;;  %v2361_v12 = vld [vmem:[#allocation8 + $0x2c4] sm:$0xf] }
  0x39   :  { %v1915_v28 = vld [vmem:[#allocation8 + $0x240] sm:$0xf]  ;;  %v2279_v31 = vld [vmem:[#allocation8 + $0x2c] sm:$0xf0]  ;;  %1048 = vmatpush.bf16.msrb.mxu2 %v1932_v24  ;;  %v1981_v13 = vld [vmem:[#allocation8 + $0x2d0] sm:$0xf0] }
  0x3a   :  { %v2043_v32 = vld [vmem:[#allocation8 + $0x340] sm:$0xf]  ;;  %v2379_v33 = vld [vmem:[#allocation8 + $0x34c] sm:$0xf0]  ;;  %v1916_v36 = vor.u32 %v2347_v29, %v1915_v28  ;;  %1061 = vmatpush.bf16.msrb.mxu3 %v2060_v26  ;;  %v1644_v38 = vor.u32 %v2279_v31, %v1643_v27  ;;  %v1709_v15 = vld [vmem:[#allocation8 + $0xb0] sm:$0xf0]  ;;  %v1984_v20 = vor.u32 %v2361_v12, %v1981_v13 }
  0x3b   :  { %v1771_v34 = vld [vmem:[#allocation8 + $0x120] sm:$0xf]  ;;  %v2311_v35 = vld [vmem:[#allocation8 + $0x12c] sm:$0xf0]  ;;  %1023 = vmatpush.bf16.msrb.mxu0 %v1660_v25  ;;  %v2044_v39 = vor.u32 %v2379_v33, %v2043_v32  ;;  %v2393_v16 = vld [vmem:[#allocation8 + $0x3c4] sm:$0xf]  ;;  %v1712_v21 = vor.u32 %v2293_v11, %v1709_v15 }
  0x3c   :  { %v1627_v37 = vld [vmem:[#allocation8] sm:$0xf]  ;;  %v2275_v40 = vld [vmem:[#allocation8 + $0xc] sm:$0xf0]  ;;  %1036 = vmatpush.bf16.msrb.mxu1 %v1788_v30  ;;  %v1772_v43 = vor.u32 %v2311_v35, %v1771_v34  ;;  %v2109_v17 = vld [vmem:[#allocation8 + $0x3d0] sm:$0xf0] }
  0x3d   :  { %v1899_v41 = vld [vmem:[#allocation8 + $0x220] sm:$0xf]  ;;  %v2343_v42 = vld [vmem:[#allocation8 + $0x22c] sm:$0xf0]  ;;  %1049 = vmatpush.bf16.msrb.mxu2 %v1916_v36  ;;  %v1628_v53 = vor.u32 %v2275_v40, %v1627_v37  ;;  %v2325_v18 = vld [vmem:[#allocation8 + $0x1a4] sm:$0xf]  ;;  %v2112_v22 = vor.u32 %v2393_v16, %v2109_v17 }
  0x3e   :  { %v1755_v44 = vld [vmem:[#allocation8 + $0x100] sm:$0xf]  ;;  %v2375_v46 = vld [vmem:[#allocation8 + $0x32c] sm:$0xf0]  ;;  %v1900_v52 = vor.u32 %v2343_v42, %v1899_v41  ;;  %1062 = vmatpush.bf16.msrb.mxu3 %v2044_v39  ;;  %v1837_v19 = vld [vmem:[#allocation8 + $0x1b0] sm:$0xf0] }
  0x3f   :  { %v2027_v45 = vld [vmem:[#allocation8 + $0x320] sm:$0xf]  ;;  %v2307_v47 = vld [vmem:[#allocation8 + $0x10c] sm:$0xf0]  ;;  %1024 = vmatpush.bf16.msrb.mxu0 %v1644_v38  ;;  %v2289_v23 = vld [vmem:[#allocation8 + $0x84] sm:$0xf]  ;;  %v1840_v26 = vor.u32 %v2325_v18, %v1837_v19 }
  0x40   :  { %v2028_v54 = vor.u32 %v2375_v46, %v2027_v45  ;;  %v1883_v56 = vld [vmem:[#allocation8 + $0x200] sm:$0xf]  ;;  %v2339_v57 = vld [vmem:[#allocation8 + $0x20c] sm:$0xf0]  ;;  %1037 = vmatpush.bf16.msrb.mxu1 %v1772_v43  ;;  %v1756_v59 = vor.u32 %v2307_v47, %v1755_v44  ;;  %v2357_v24 = vld [vmem:[#allocation8 + $0x2a4] sm:$0xf] }
  0x41   :  { %v2011_v58 = vld [vmem:[#allocation8 + $0x300] sm:$0xf]  ;;  %v2371_v61 = vld [vmem:[#allocation8 + $0x30c] sm:$0xf0]  ;;  %1050 = vmatpush.bf16.msrb.mxu2 %v1900_v52  ;;  %v1884_v6 = vor.u32 %v2339_v57, %v1883_v56  ;;  %v1965_v25 = vld [vmem:[#allocation8 + $0x2b0] sm:$0xf0] }
  0x42   :  { %1063 = vmatpush.bf16.msrb.mxu3 %v2028_v54  ;;  %v2012_v7 = vor.u32 %v2371_v61, %v2011_v58  ;;  %v1693_v27 = vld [vmem:[#allocation8 + $0x90] sm:$0xf0]  ;;  %v2389_v28 = vld [vmem:[#allocation8 + $0x3a4] sm:$0xf]  ;;  %v1968_v32 = vor.u32 %v2357_v24, %v1965_v25 }
  0x43   :  { %1025 = vmatpush.bf16.msrb.mxu0 %v1628_v53  ;;  %v2093_v29 = vld [vmem:[#allocation8 + $0x3b0] sm:$0xf0]  ;;  %v2321_v30 = vld [vmem:[#allocation8 + $0x184] sm:$0xf]  ;;  %v1696_v33 = vor.u32 %v2289_v23, %v1693_v27 }
  0x44   :  { %1038 = vmatpush.bf16.msrb.mxu1 %v1756_v59  ;;  %v1821_v31 = vld [vmem:[#allocation8 + $0x190] sm:$0xf0]  ;;  %v2096_v34 = vor.u32 %v2389_v28, %v2093_v29  ;;  %v2285_v35 = vld [vmem:[#allocation8 + $0x64] sm:$0xf] }
  0x45   :  { %1051 = vmatpush.bf16.msrb.mxu2 %v1884_v6  ;;  %v2353_v36 = vld [vmem:[#allocation8 + $0x284] sm:$0xf]  ;;  %v1949_v37 = vld [vmem:[#allocation8 + $0x290] sm:$0xf0]  ;;  %v1824_v38 = vor.u32 %v2321_v30, %v1821_v31 }
  0x46   :  { %1064 = vmatpush.bf16.msrb.mxu3 %v2012_v7  ;;  %v1677_v39 = vld [vmem:[#allocation8 + $0x70] sm:$0xf0]  ;;  %v2385_v40 = vld [vmem:[#allocation8 + $0x384] sm:$0xf]  ;;  %v1952_v44 = vor.u32 %v2353_v36, %v1949_v37  ;;  %v2336_v36 = vld [vmem:[#allocation8 + $0x1f4] sm:$0xf0] }
  0x47   :  { %1070 = vmatpush.bf16.msra.mxu0 %v1744_v60  ;;  %v2077_v41 = vld [vmem:[#allocation8 + $0x390] sm:$0xf0]  ;;  %v2317_v42 = vld [vmem:[#allocation8 + $0x164] sm:$0xf]  ;;  %v1680_v45 = vor.u32 %v2285_v35, %v1677_v39  ;;  %v1875_v35 = vld [vmem:[#allocation8 + $0x1e8] sm:$0xf] }
  0x48   :  { %1083 = vmatpush.bf16.msra.mxu1 %v1872_v0  ;;  %v1805_v43 = vld [vmem:[#allocation8 + $0x170] sm:$0xf0]  ;;  %v2080_v46 = vor.u32 %v2385_v40, %v2077_v41  ;;  %v2281_v48 = vld [vmem:[#allocation8 + $0x44] sm:$0xf] }
  0x49   :  { %1096 = vmatpush.bf16.msra.mxu2 %v2000_v8  ;;  %v1808_v47 = vor.u32 %v2317_v42, %v1805_v43  ;;  %v1661_v49 = vld [vmem:[#allocation8 + $0x50] sm:$0xf0]  ;;  %v2313_v50 = vld [vmem:[#allocation8 + $0x144] sm:$0xf]  ;;  %v1876_v43 = vor.u32 %v2336_v36, %v1875_v35 }
  0x4a   :  { %1109 = vmatpush.bf16.msra.mxu3 %v2128_v10  ;;  %v1789_v51 = vld [vmem:[#allocation8 + $0x150] sm:$0xf0]  ;;  %v1664_v52 = vor.u32 %v2281_v48, %v1661_v49  ;;  %v2349_v54 = vld [vmem:[#allocation8 + $0x264] sm:$0xf]  ;;  %v2332_v48 = vld [vmem:[#allocation8 + $0x1d4] sm:$0xf0] }
  0x4b   :  { %1071 = vmatpush.bf16.msra.mxu0 %v1728_v9  ;;  %v1792_v53 = vor.u32 %v2313_v50, %v1789_v51  ;;  %v1933_v55 = vld [vmem:[#allocation8 + $0x270] sm:$0xf0]  ;;  %v2381_v56 = vld [vmem:[#allocation8 + $0x364] sm:$0xf] }
  0x4c   :  { %1084 = vmatpush.bf16.msra.mxu1 %v1856_v14  ;;  %v1936_v57 = vor.u32 %v2349_v54, %v1933_v55  ;;  %v2061_v58 = vld [vmem:[#allocation8 + $0x370] sm:$0xf0]  ;;  %v2277_v60 = vld [vmem:[#allocation8 + $0x24] sm:$0xf]  ;;  %v2003_v54 = vld [vmem:[#allocation8 + $0x2e8] sm:$0xf] }
  0x4d   :  { %1097 = vmatpush.bf16.msra.mxu2 %v1984_v20  ;;  %v2064_v59 = vor.u32 %v2381_v56, %v2061_v58  ;;  %v1645_v61 = vld [vmem:[#allocation8 + $0x30] sm:$0xf0]  ;;  %v2309_v63 = vld [vmem:[#allocation8 + $0x124] sm:$0xf]  ;;  %v2368_v55 = vld [vmem:[#allocation8 + $0x2f4] sm:$0xf0] }
  0x4e   :  { %1110 = vmatpush.bf16.msra.mxu3 %v2112_v22  ;;  %v1648_v62 = vor.u32 %v2277_v60, %v1645_v61  ;;  %v1773_v0 = vld [vmem:[#allocation8 + $0x130] sm:$0xf0]  ;;  %v2345_v2 = vld [vmem:[#allocation8 + $0x244] sm:$0xf]  ;;  %v2131_v56 = vld [vmem:[#allocation8 + $0x3e8] sm:$0xf] }
  0x4f   :  { %1072 = vmatpush.bf16.msra.mxu0 %v1712_v21  ;;  %v1776_v1 = vor.u32 %v2309_v63, %v1773_v0  ;;  %v1917_v3 = vld [vmem:[#allocation8 + $0x250] sm:$0xf0]  ;;  %v2377_v4 = vld [vmem:[#allocation8 + $0x344] sm:$0xf]  ;;  %v2400_v60 = vld [vmem:[#allocation8 + $0x3f4] sm:$0xf0] }
  0x50   :  { %1085 = vmatpush.bf16.msra.mxu1 %v1840_v26  ;;  %v1920_v5 = vor.u32 %v2345_v2, %v1917_v3  ;;  %v2045_v6 = vld [vmem:[#allocation8 + $0x350] sm:$0xf0]  ;;  %v2273_v8 = vld [vmem:[#allocation8 + $0x4] sm:$0xf]  ;;  %v126_v26 = vld [vmem:[#allocation7] sm:$0xf]  ;;  %v2004_v3 = vor.u32 %v2368_v55, %v2003_v54 }
  0x51   :  { %1098 = vmatpush.bf16.msra.mxu2 %v1968_v32  ;;  %v2048_v7 = vor.u32 %v2377_v4, %v2045_v6  ;;  %v1629_v9 = vld [vmem:[#allocation8 + $0x10] sm:$0xf0]  ;;  %v2305_v10 = vld [vmem:[#allocation8 + $0x104] sm:$0xf]  ;;  %v128_v27 = vperm.slane %v126_v26, 0  ;;  %v129_v28 = vperm.slane %v126_v26, 1 }
  0x52   :  { %1111 = vmatpush.bf16.msra.mxu3 %v2096_v34  ;;  %v1632_v11 = vor.u32 %v2273_v8, %v1629_v9  ;;  %v1757_v12 = vld [vmem:[#allocation8 + $0x110] sm:$0xf0]  ;;  %v2341_v14 = vld [vmem:[#allocation8 + $0x224] sm:$0xf]  ;;  %v1747_v32 = vld [vmem:[#allocation8 + $0xe8] sm:$0xf] }
  0x53   :  { %1073 = vmatpush.bf16.msra.mxu0 %v1696_v33  ;;  %v1760_v13 = vor.u32 %v2305_v10, %v1757_v12  ;;  %v1901_v15 = vld [vmem:[#allocation8 + $0x230] sm:$0xf0]  ;;  %v2373_v17 = vld [vmem:[#allocation8 + $0x324] sm:$0xf]  ;;  %v2304_v33 = vld [vmem:[#allocation8 + $0xf4] sm:$0xf0] }
  0x54   :  { %1086 = vmatpush.bf16.msra.mxu1 %v1824_v38  ;;  %v1904_v16 = vor.u32 %v2341_v14, %v1901_v15  ;;  %v2029_v18 = vld [vmem:[#allocation8 + $0x330] sm:$0xf0]  ;;  %v2337_v20 = vld [vmem:[#allocation8 + $0x204] sm:$0xf]  ;;  %v130_v39 = vperm.slane %v126_v26, 2  ;;  %v1748_v40 = vor.u32 %v2304_v33, %v1747_v32  ;;  %v131_v42 = vperm.slane %v126_v26, 3 }
  0x55   :  { %1099 = vmatpush.bf16.msra.mxu2 %v1952_v44  ;;  %v2032_v19 = vor.u32 %v2373_v17, %v2029_v18  ;;  %v1885_v21 = vld [vmem:[#allocation8 + $0x210] sm:$0xf0]  ;;  %v2369_v23 = vld [vmem:[#allocation8 + $0x304] sm:$0xf]  ;;  %v1731_v44 = vld [vmem:[#allocation8 + $0xc8] sm:$0xf] }
  0x56   :  { %1112 = vmatpush.bf16.msra.mxu3 %v2080_v46  ;;  %v1888_v22 = vor.u32 %v2337_v20, %v1885_v21  ;;  %v2013_v24 = vld [vmem:[#allocation8 + $0x310] sm:$0xf0]  ;;  %v1715_v61 = vld [vmem:[#allocation8 + $0xa8] sm:$0xf]  ;;  %v2364_v8 = vld [vmem:[#allocation8 + $0x2d4] sm:$0xf0] }
  0x57   :  { %1074 = vmatpush.bf16.msra.mxu0 %v1680_v45  ;;  %v2016_v25 = vor.u32 %v2369_v23, %v2013_v24  ;;  %v2300_v45 = vld [vmem:[#allocation8 + $0xd4] sm:$0xf0]  ;;  %v1843_v0 = vld [vmem:[#allocation8 + $0x1a8] sm:$0xf] }
  0x58   :  { %1087 = vmatpush.bf16.msra.mxu1 %v1808_v47  ;;  %v1859_v47 = vld [vmem:[#allocation8 + $0x1c8] sm:$0xf]  ;;  %v2396_v12 = vld [vmem:[#allocation8 + $0x3d4] sm:$0xf0] }
  0x59   :  { %1100 = vmatpush.bf16.msra.mxu2 %v1936_v57  ;;  %v2115_v9 = vld [vmem:[#allocation8 + $0x3c8] sm:$0xf]  ;;  %v2292_v14 = vld [vmem:[#allocation8 + $0x94] sm:$0xf0] }
  0x5a   :  { %1113 = vmatpush.bf16.msra.mxu3 %v2064_v59  ;;  %v1860_v59 = vor.u32 %v2332_v48, %v1859_v47  ;;  %v1827_v15 = vld [vmem:[#allocation8 + $0x188] sm:$0xf]  ;;  %v2116_v20 = vor.u32 %v2396_v12, %v2115_v9  ;;  %v2360_v23 = vld [vmem:[#allocation8 + $0x2b4] sm:$0xf0]  ;;  %v2334_v9 = vld [vmem:[#allocation8 + $0x1ec] sm:$0xf] }
  0x5b   :  { %1075 = vmatpush.bf16.msra.mxu0 %v1664_v52  ;;  %v2392_v26 = vld [vmem:[#allocation8 + $0x3b4] sm:$0xf0]  ;;  %v1955_v33 = vld [vmem:[#allocation8 + $0x288] sm:$0xf] }
  0x5c   :  { %1088 = vmatpush.bf16.msra.mxu1 %v1792_v53  ;;  %v1732_v53 = vor.u32 %v2300_v45, %v1731_v44  ;;  %v1939_v47 = vld [vmem:[#allocation8 + $0x268] sm:$0xf]  ;;  %v2352_v48 = vld [vmem:[#allocation8 + $0x274] sm:$0xf0] }
  0x5d   :  { %1101 = vmatpush.bf16.msra.mxu2 %v1920_v5  ;;  %v2132_v5 = vor.u32 %v2400_v60, %v2131_v56  ;;  %v2280_v54 = vld [vmem:[#allocation8 + $0x34] sm:$0xf0]  ;;  %v1779_v55 = vld [vmem:[#allocation8 + $0x128] sm:$0xf] }
  0x5e   :  { %1114 = vmatpush.bf16.msra.mxu3 %v2048_v7  ;;  %v1987_v7 = vld [vmem:[#allocation8 + $0x2c8] sm:$0xf]  ;;  %v2312_v56 = vld [vmem:[#allocation8 + $0x134] sm:$0xf0] }
  0x5f   :  { %1076 = vmatpush.bf16.msra.mxu0 %v1648_v62  ;;  %v2296_v62 = vld [vmem:[#allocation8 + $0xb4] sm:$0xf0]  ;;  %v1988_v18 = vor.u32 %v2364_v8, %v1987_v7  ;;  %v1749_v8 = vld [vmem:[#allocation8 + $0xf8] sm:$0xf0] }
  0x60   :  { %1089 = vmatpush.bf16.msra.mxu1 %v1776_v1  ;;  %v2328_v1 = vld [vmem:[#allocation8 + $0x1b4] sm:$0xf0]  ;;  %v1716_v6 = vor.u32 %v2296_v62, %v1715_v61  ;;  %v2051_v61 = vld [vmem:[#allocation8 + $0x348] sm:$0xf] }
  0x61   :  { %1102 = vmatpush.bf16.msra.mxu2 %v1904_v16  ;;  %v2324_v16 = vld [vmem:[#allocation8 + $0x194] sm:$0xf0] }
  0x62   :  { %1115 = vmatpush.bf16.msra.mxu3 %v2032_v19  ;;  %v1828_v24 = vor.u32 %v2324_v16, %v1827_v15  ;;  %v2348_v60 = vld [vmem:[#allocation8 + $0x254] sm:$0xf0] }
  0x63   :  { %1077 = vmatpush.bf16.msra.mxu0 %v1632_v11  ;;  %v1844_v11 = vor.u32 %v2328_v1, %v1843_v0  ;;  %v2380_v0 = vld [vmem:[#allocation8 + $0x354] sm:$0xf0]  ;;  %v1635_v1 = vld [vmem:[#allocation8 + $0x8] sm:$0xf] }
  0x64   :  { %1090 = vmatpush.bf16.msra.mxu1 %v1760_v13  ;;  %v1699_v13 = vld [vmem:[#allocation8 + $0x88] sm:$0xf]  ;;  %v2052_v12 = vor.u32 %v2380_v0, %v2051_v61  ;;  %v2101_v0 = vld [vmem:[#allocation8 + $0x3b8] sm:$0xf0] }
  0x65   :  { %1103 = vmatpush.bf16.msra.mxu2 %v1888_v22  ;;  %v1700_v21 = vor.u32 %v2292_v14, %v1699_v13  ;;  %v1971_v22 = vld [vmem:[#allocation8 + $0x2a8] sm:$0xf]  ;;  %v2344_v14 = vld [vmem:[#allocation8 + $0x234] sm:$0xf0] }
  0x66   :  { %1116 = vmatpush.bf16.msra.mxu3 %v2016_v25  ;;  %v2099_v25 = vld [vmem:[#allocation8 + $0x3a8] sm:$0xf] }
  0x67   :  { %v2100_v32 = vor.u32 %v2392_v26, %v2099_v25  ;;  %v1907_v13 = vld [vmem:[#allocation8 + $0x228] sm:$0xf]  ;;  %v1861_v25 = vld [vmem:[#allocation8 + $0x1d8] sm:$0xf0] }
  0xa3   :  { %v189_v29 = vpop.f32.mrf.mxu0 }
  0xa4   :  { %v190_v30 = vadd.f32 %v189_v29, %v128_v27  ;;  %v202_v31 = vpop.f32.mrf.mxu1  ;;  %v1683_v27 = vld [vmem:[#allocation8 + $0x68] sm:$0xf] }
  0xa5   :  { %v203_v34 = vadd.f32 %v202_v31, %v129_v28  ;;  %v2288_v28 = vld [vmem:[#allocation8 + $0x74] sm:$0xf0]  ;;  %v1811_v29 = vld [vmem:[#allocation8 + $0x168] sm:$0xf]  ;;  %v1972_v31 = vor.u32 %v2360_v23, %v1971_v22  ;;  %v1908_v22 = vor.u32 %v2344_v14, %v1907_v13  ;;  %v1733_v23 = vld [vmem:[#allocation8 + $0xd8] sm:$0xf0] }
  0xa6   :  { %v232_v37 = vmax.f32 %v190_v30, 0.0  ;;  %v2320_v30 = vld [vmem:[#allocation8 + $0x174] sm:$0xf0]  ;;  %v1684_v35 = vor.u32 %v2288_v28, %v1683_v27  ;;  %v1891_v27 = vld [vmem:[#allocation8 + $0x208] sm:$0xf] }
  0xa7   :  { %v233_v38 = vmax.f32 %v203_v34, 0.0  ;;  %v2356_v34 = vld [vmem:[#allocation8 + $0x294] sm:$0xf0]  ;;  %v1812_v36 = vor.u32 %v2320_v30, %v1811_v29  ;;  %v2019_v29 = vld [vmem:[#allocation8 + $0x308] sm:$0xf] }
  0xa8   :  { %v2700_v41 = vpack.c.bf16 %v232_v37, %v232_v37  ;;  %v2083_v37 = vld [vmem:[#allocation8 + $0x388] sm:$0xf]  ;;  %v1956_v44 = vor.u32 %v2356_v34, %v1955_v33  ;;  %v2340_v28 = vld [vmem:[#allocation8 + $0x214] sm:$0xf0]  ;;  %v2386_v13 = vld [vmem:[#allocation8 + $0x38c] sm:$0xf] }
  0xa9   :  { %v2702_v46 = vpack.c.bf16 %v233_v38, %v233_v38  ;;  %v2388_v38 = vld [vmem:[#allocation8 + $0x394] sm:$0xf0]  ;;  %v2085_v14 = vld [vmem:[#allocation8 + $0x398] sm:$0xf0] }
  0xaa   :  { %1026 = vmatmul.bf16.vlgmr.msrb.gmra.mxu0 %v2700_v41  ;;  %v2084_v45 = vor.u32 %v2388_v38, %v2083_v37  ;;  %v2372_v30 = vld [vmem:[#allocation8 + $0x314] sm:$0xf0]  ;;  %v2294_v37 = vld [vmem:[#allocation8 + $0xac] sm:$0xf]  ;;  %v1892_v38 = vor.u32 %v2340_v28, %v1891_v27  ;;  %v1653_v28 = vld [vmem:[#allocation8 + $0x38] sm:$0xf0] }
  0xab   :  { %v215_v49 = vpop.f32.mrf.mxu2  ;;  %1039 = vmatmul.bf16.vlgmr.msrb.gmra.mxu1 %v2702_v46  ;;  %1122 = vmatpush.bf16.msrb.mxu0 %v1748_v40  ;;  %v191_v52 = vpop.f32.mrf.mxu0  ;;  %v2284_v40 = vld [vmem:[#allocation8 + $0x54] sm:$0xf0]  ;;  %v2278_v27 = vld [vmem:[#allocation8 + $0x2c] sm:$0xf] }
  0xac   :  { %v216_v50 = vadd.f32 %v215_v49, %v130_v39  ;;  %v228_v51 = vpop.f32.mrf.mxu3  ;;  %1135 = vmatpush.bf16.msrb.mxu1 %v1876_v43  ;;  %v204_v58 = vpop.f32.mrf.mxu1  ;;  %v1667_v39 = vld [vmem:[#allocation8 + $0x48] sm:$0xf]  ;;  %v2316_v43 = vld [vmem:[#allocation8 + $0x154] sm:$0xf0] }
  0xad   :  { %v229_v57 = vadd.f32 %v228_v51, %v131_v42  ;;  %v1795_v42 = vld [vmem:[#allocation8 + $0x148] sm:$0xf]  ;;  %v1668_v49 = vor.u32 %v2284_v40, %v1667_v39  ;;  %v2384_v52 = vld [vmem:[#allocation8 + $0x374] sm:$0xf0]  ;;  %v1717_v39 = vld [vmem:[#allocation8 + $0xb8] sm:$0xf0] }
  0xae   :  { %v234_v63 = vmax.f32 %v216_v50, 0.0  ;;  %v1796_v50 = vor.u32 %v2316_v43, %v1795_v42  ;;  %v2067_v51 = vld [vmem:[#allocation8 + $0x368] sm:$0xf]  ;;  %v2326_v40 = vld [vmem:[#allocation8 + $0x1ac] sm:$0xf]  ;;  %v2020_v43 = vor.u32 %v2372_v30, %v2019_v29 }
  0xaf   :  { %v235_v2 = vmax.f32 %v229_v57, 0.0  ;;  %1123 = vmatpush.bf16.msrb.mxu0 %v1732_v53  ;;  %v1651_v53 = vld [vmem:[#allocation8 + $0x28] sm:$0xf]  ;;  %v1940_v57 = vor.u32 %v2352_v48, %v1939_v47  ;;  %v2068_v58 = vor.u32 %v2384_v52, %v2067_v51  ;;  %v1845_v42 = vld [vmem:[#allocation8 + $0x1b8] sm:$0xf0] }
  0xb0   :  { %v2706_v4 = vpack.c.bf16 %v234_v63, %v234_v63  ;;  %1136 = vmatpush.bf16.msrb.mxu1 %v1860_v59  ;;  %v1923_v59 = vld [vmem:[#allocation8 + $0x248] sm:$0xf]  ;;  %v1652_v62 = vor.u32 %v2280_v54, %v1651_v53  ;;  %v1780_v63 = vor.u32 %v2312_v56, %v1779_v55  ;;  %v2362_v47 = vld [vmem:[#allocation8 + $0x2cc] sm:$0xf]  ;;  %v1989_v48 = vld [vmem:[#allocation8 + $0x2d8] sm:$0xf0] }
  0xb1   :  { %v2708_v10 = vpack.c.bf16 %v235_v2, %v235_v2  ;;  %v2276_v2 = vld [vmem:[#allocation8 + $0x14] sm:$0xf0]  ;;  %v1924_v7 = vor.u32 %v2348_v60, %v1923_v59  ;;  %v2394_v51 = vld [vmem:[#allocation8 + $0x3cc] sm:$0xf]  ;;  %v2117_v52 = vld [vmem:[#allocation8 + $0x3d8] sm:$0xf0] }
  0xb2   :  { %1052 = vmatmul.bf16.vlgmr.msrb.gmra.mxu2 %v2706_v4  ;;  %v1636_v15 = vor.u32 %v2276_v2, %v1635_v1  ;;  %v2290_v53 = vld [vmem:[#allocation8 + $0x8c] sm:$0xf]  ;;  %v1701_v54 = vld [vmem:[#allocation8 + $0x98] sm:$0xf0] }
  0xb3   :  { %1065 = vmatmul.bf16.vlgmr.msrb.gmra.mxu3 %v2708_v10  ;;  %1148 = vmatpush.bf16.msrb.mxu2 %v2004_v3  ;;  %v217_v17 = vpop.f32.mrf.mxu2  ;;  %v1763_v3 = vld [vmem:[#allocation8 + $0x108] sm:$0xf]  ;;  %v2322_v55 = vld [vmem:[#allocation8 + $0x18c] sm:$0xf]  ;;  %v1829_v56 = vld [vmem:[#allocation8 + $0x198] sm:$0xf0]  ;;  %v1704_v61 = vor.u32 %v2290_v53, %v1701_v54 }
  0xb4   :  { %1161 = vmatpush.bf16.msrb.mxu3 %v2132_v5  ;;  %v230_v19 = vpop.f32.mrf.mxu3  ;;  %1124 = vmatpush.bf16.msrb.mxu0 %v1716_v6  ;;  %v2308_v5 = vld [vmem:[#allocation8 + $0x114] sm:$0xf0]  ;;  %v2302_v6 = vld [vmem:[#allocation8 + $0xec] sm:$0xf]  ;;  %v2035_v17 = vld [vmem:[#allocation8 + $0x328] sm:$0xf] }
  0xb5   :  { %1137 = vmatpush.bf16.msrb.mxu1 %v1844_v11  ;;  %v1877_v11 = vld [vmem:[#allocation8 + $0x1f8] sm:$0xf0]  ;;  %v1764_v16 = vor.u32 %v2308_v5, %v1763_v3  ;;  %v1752_v19 = vor.u32 %v2302_v6, %v1749_v8  ;;  %v2358_v59 = vld [vmem:[#allocation8 + $0x2ac] sm:$0xf] }
  0xb6   :  { %v1973_v60 = vld [vmem:[#allocation8 + $0x2b8] sm:$0xf0]  ;;  %v2286_v1 = vld [vmem:[#allocation8 + $0x6c] sm:$0xf] }
  0xb7   :  { %1149 = vmatpush.bf16.msrb.mxu2 %v1988_v18  ;;  %v2376_v18 = vld [vmem:[#allocation8 + $0x334] sm:$0xf0]  ;;  %v1685_v2 = vld [vmem:[#allocation8 + $0x78] sm:$0xf0]  ;;  %v2318_v3 = vld [vmem:[#allocation8 + $0x16c] sm:$0xf]  ;;  %v1976_v6 = vor.u32 %v2358_v59, %v1973_v60 }
  0xb8   :  { %1162 = vmatpush.bf16.msrb.mxu3 %v2116_v20  ;;  %1125 = vmatpush.bf16.msrb.mxu0 %v1700_v21  ;;  %v1880_v20 = vor.u32 %v2334_v9, %v1877_v11  ;;  %v2298_v21 = vld [vmem:[#allocation8 + $0xcc] sm:$0xf]  ;;  %v2036_v26 = vor.u32 %v2376_v18, %v2035_v17  ;;  %v1813_v5 = vld [vmem:[#allocation8 + $0x178] sm:$0xf0]  ;;  %v1688_v11 = vor.u32 %v2286_v1, %v1685_v2  ;;  %v2407_v60 = vld [vmem:[#allocation11 + $0x30] sm:$0xff] }
  0xb9   :  { %1138 = vmatpush.bf16.msrb.mxu1 %v1828_v24  ;;  %v2330_v24 = vld [vmem:[#allocation8 + $0x1cc] sm:$0xf]  ;;  %v1736_v33 = vor.u32 %v2298_v21, %v1733_v23  ;;  %v1957_v9 = vld [vmem:[#allocation8 + $0x298] sm:$0xf0] }
  0xba   :  { %1078 = vmatmul.bf16.vlgmr.msra.gmra.mxu0 %v2700_v41  ;;  %v1864_v34 = vor.u32 %v2330_v24, %v1861_v25  ;;  %v2354_v8 = vld [vmem:[#allocation8 + $0x28c] sm:$0xf]  ;;  %v1797_v18 = vld [vmem:[#allocation8 + $0x158] sm:$0xf0] }
  0xbb   :  { %1150 = vmatpush.bf16.msrb.mxu2 %v1972_v31  ;;  %1091 = vmatmul.bf16.vlgmr.msra.gmra.mxu1 %v2702_v46  ;;  %v2366_v31 = vld [vmem:[#allocation8 + $0x2ec] sm:$0xf]  ;;  %v1781_v30 = vld [vmem:[#allocation8 + $0x138] sm:$0xf0] }
  0xbc   :  { %1163 = vmatpush.bf16.msrb.mxu3 %v2100_v32  ;;  %1126 = vmatpush.bf16.msrb.mxu0 %v1684_v35  ;;  %v2005_v32 = vld [vmem:[#allocation8 + $0x2f8] sm:$0xf0]  ;;  %v2398_v35 = vld [vmem:[#allocation8 + $0x3ec] sm:$0xf] }
  0xbd   :  { %1139 = vmatpush.bf16.msrb.mxu1 %v1812_v36  ;;  %v2133_v36 = vld [vmem:[#allocation8 + $0x3f8] sm:$0xf0]  ;;  %v2314_v17 = vld [vmem:[#allocation8 + $0x14c] sm:$0xf] }
  0xbe   :  { %v2350_v21 = vld [vmem:[#allocation8 + $0x26c] sm:$0xf]  ;;  %v1800_v24 = vor.u32 %v2314_v17, %v1797_v18  ;;  %v2408_v53 = vld [vmem:[#allocation11 + $0x38] sm:$0xff]  ;;  %v2409_v17 = vld [vmem:[#allocation11 + $0x40] sm:$0xff] }
  0xbf   :  { %1151 = vmatpush.bf16.msrb.mxu2 %v1956_v44  ;;  %v2008_v44 = vor.u32 %v2366_v31, %v2005_v32  ;;  %v2382_v25 = vld [vmem:[#allocation8 + $0x36c] sm:$0xf]  ;;  %v2021_v59 = vld [vmem:[#allocation8 + $0x318] sm:$0xf0]  ;;  %v2421_v18 = vld [vmem:[#allocation11 + $0xa0] sm:$0xff] }
  0xc0   :  { %1164 = vmatpush.bf16.msrb.mxu3 %v2084_v45  ;;  %1127 = vmatpush.bf16.msrb.mxu0 %v1668_v49  ;;  %v2136_v45 = vor.u32 %v2398_v35, %v2133_v36  ;;  %v1720_v49 = vor.u32 %v2294_v37, %v1717_v39  ;;  %v2310_v29 = vld [vmem:[#allocation8 + $0x12c] sm:$0xf]  ;;  %v1656_v35 = vor.u32 %v2278_v27, %v1653_v28  ;;  %v2416_v1 = vld [vmem:[#allocation11 + $0x78] sm:$0xff] }
  0xc1   :  { %1140 = vmatpush.bf16.msrb.mxu1 %v1796_v50  ;;  %v1848_v50 = vor.u32 %v2326_v40, %v1845_v42  ;;  %v1784_v36 = vor.u32 %v2310_v29, %v1781_v30  ;;  %v2378_v37 = vld [vmem:[#allocation8 + $0x34c] sm:$0xf]  ;;  %v1637_v40 = vld [vmem:[#allocation8 + $0x18] sm:$0xf0] }
  0xc2   :  { %1104 = vmatmul.bf16.vlgmr.msra.gmra.mxu2 %v2706_v4  ;;  %v2274_v39 = vld [vmem:[#allocation8 + $0xc] sm:$0xf]  ;;  %v2404_v2 = vld [vmem:[#allocation11 + $0x18] sm:$0xff] }
  0xc3   :  { %1117 = vmatmul.bf16.vlgmr.msra.gmra.mxu3 %v2708_v10  ;;  %1152 = vmatpush.bf16.msrb.mxu2 %v1940_v57  ;;  %v1992_v57 = vor.u32 %v2362_v47, %v1989_v48  ;;  %v2306_v42 = vld [vmem:[#allocation8 + $0x10c] sm:$0xf]  ;;  %v1909_v48 = vld [vmem:[#allocation8 + $0x238] sm:$0xf0] }
  0xc4   :  { %1165 = vmatpush.bf16.msrb.mxu3 %v2068_v58  ;;  %1128 = vmatpush.bf16.msrb.mxu0 %v1652_v62  ;;  %v2120_v58 = vor.u32 %v2394_v51, %v2117_v52  ;;  %v1832_v62 = vor.u32 %v2322_v55, %v1829_v56  ;;  %v2342_v47 = vld [vmem:[#allocation8 + $0x22c] sm:$0xf]  ;;  %v2037_v52 = vld [vmem:[#allocation8 + $0x338] sm:$0xf0] }
  0xc5   :  { %1141 = vmatpush.bf16.msrb.mxu1 %v1780_v63  ;;  %v2390_v63 = vld [vmem:[#allocation8 + $0x3ac] sm:$0xf]  ;;  %v1912_v54 = vor.u32 %v2342_v47, %v1909_v48 }
  0xc6   :  { %v2374_v51 = vld [vmem:[#allocation8 + $0x32c] sm:$0xf] }
  0xc7   :  { %1153 = vmatpush.bf16.msrb.mxu2 %v1924_v7  ;;  %v2104_v7 = vor.u32 %v2390_v63, %v2101_v0  ;;  %v2040_v55 = vor.u32 %v2374_v51, %v2037_v52  ;;  %v2338_v56 = vld [vmem:[#allocation8 + $0x20c] sm:$0xf]  ;;  %v2405_v0 = vld [vmem:[#allocation11 + $0x20] sm:$0xff] }
  0xc8   :  { %1166 = vmatpush.bf16.msrb.mxu3 %v2052_v12  ;;  %1129 = vmatpush.bf16.msrb.mxu0 %v1636_v15  ;;  %v1816_v12 = vor.u32 %v2318_v3, %v1813_v5  ;;  %v2282_v15 = vld [vmem:[#allocation8 + $0x4c] sm:$0xf]  ;;  %v2403_v3 = vld [vmem:[#allocation11 + $0x10] sm:$0xff] }
  0xc9   :  { %1142 = vmatpush.bf16.msrb.mxu1 %v1764_v16  ;;  %v1669_v16 = vld [vmem:[#allocation8 + $0x58] sm:$0xf0]  ;;  %v2406_v63 = vld [vmem:[#allocation11 + $0x28] sm:$0xff] }
  0xca   :  { %v1672_v23 = vor.u32 %v2282_v15, %v1669_v16  ;;  %v2414_v5 = vld [vmem:[#allocation11 + $0x68] sm:$0xff] }
  0xcb   :  { %1154 = vmatpush.bf16.msrb.mxu2 %v1908_v22  ;;  %1130 = vmatmul.bf16.vlgmr.msrb.gmra.mxu0 %v2700_v41  ;;  %v1941_v22 = vld [vmem:[#allocation8 + $0x278] sm:$0xf0]  ;;  %v2418_v28 = vld [vmem:[#allocation11 + $0x88] sm:$0xff] }
  0xcc   :  { %1174 = vmatpush.bf16.msra.mxu0 %v1752_v19  ;;  %1167 = vmatpush.bf16.msrb.mxu3 %v2036_v26  ;;  %v1960_v19 = vor.u32 %v2354_v8, %v1957_v9  ;;  %v2069_v26 = vld [vmem:[#allocation8 + $0x378] sm:$0xf0]  ;;  %v1944_v31 = vor.u32 %v2350_v21, %v1941_v22  ;;  %v2411_v8 = vld [vmem:[#allocation11 + $0x50] sm:$0xff] }
  0xcd   :  { %1187 = vmatpush.bf16.msra.mxu1 %v1880_v20  ;;  %v2088_v20 = vor.u32 %v2386_v13, %v2085_v14  ;;  %v2072_v32 = vor.u32 %v2382_v25, %v2069_v26  ;;  %v2423_v9 = vld [vmem:[#allocation11 + $0xb0] sm:$0xff]  ;;  %v2422_v13 = vld [vmem:[#allocation11 + $0xa8] sm:$0xff] }
  0xce   :  { %1143 = vmatmul.bf16.vlgmr.msrb.gmra.mxu1 %v2702_v46 }
  0xcf   :  { %1155 = vmatpush.bf16.msrb.mxu2 %v1892_v38  ;;  %v2053_v38 = vld [vmem:[#allocation8 + $0x358] sm:$0xf0] }
  0xd0   :  { %1175 = vmatpush.bf16.msra.mxu0 %v1736_v33  ;;  %1168 = vmatpush.bf16.msrb.mxu3 %v2020_v43  ;;  %v2346_v33 = vld [vmem:[#allocation8 + $0x24c] sm:$0xf]  ;;  %v1765_v43 = vld [vmem:[#allocation8 + $0x118] sm:$0xf0] }
  0xd1   :  { %1188 = vmatpush.bf16.msra.mxu1 %v1864_v34  ;;  %v1925_v34 = vld [vmem:[#allocation8 + $0x258] sm:$0xf0] }
  0xd2   :  { %1156 = vmatmul.bf16.vlgmr.msrb.gmra.mxu2 %v2706_v4 }
  0xd3   :  { %1200 = vmatpush.bf16.msra.mxu2 %v2008_v44  ;;  %1169 = vmatmul.bf16.vlgmr.msrb.gmra.mxu3 %v2708_v10  ;;  %v1928_v44 = vor.u32 %v2346_v33, %v1925_v34  ;;  %v2417_v33 = vld [vmem:[#allocation11 + $0x80] sm:$0xff]  ;;  %v2432_v34 = vld [vmem:[#allocation11 + $0xf8] sm:$0xff] }
  0xd4   :  { %1213 = vmatpush.bf16.msra.mxu3 %v2136_v45  ;;  %1176 = vmatpush.bf16.msra.mxu0 %v1720_v49  ;;  %v2056_v45 = vor.u32 %v2378_v37, %v2053_v38  ;;  %v1640_v49 = vor.u32 %v2274_v39, %v1637_v40  ;;  %v2431_v39 = vld [vmem:[#allocation11 + $0xf0] sm:$0xff] }
  0xd5   :  { %1189 = vmatpush.bf16.msra.mxu1 %v1848_v50  ;;  %v1768_v50 = vor.u32 %v2306_v42, %v1765_v43 }
  0xd7   :  { %1201 = vmatpush.bf16.msra.mxu2 %v1992_v57  ;;  %v1893_v57 = vld [vmem:[#allocation8 + $0x218] sm:$0xf0] }
  0xd8   :  { %1214 = vmatpush.bf16.msra.mxu3 %v2120_v58  ;;  %1177 = vmatpush.bf16.msra.mxu0 %v1704_v61  ;;  %v2370_v58 = vld [vmem:[#allocation8 + $0x30c] sm:$0xf]  ;;  %v1896_v61 = vor.u32 %v2338_v56, %v1893_v57 }
  0xd9   :  { %1190 = vmatpush.bf16.msra.mxu1 %v1832_v62  ;;  %v2024_v62 = vor.u32 %v2370_v58, %v2021_v59 }
  0xdb   :  { %1202 = vmatpush.bf16.msra.mxu2 %v1976_v6  ;;  %v2401_v6 = vld [vmem:[#allocation11] sm:$0xff] }
  0xdc   :  { %1215 = vmatpush.bf16.msra.mxu3 %v2104_v7  ;;  %1178 = vmatpush.bf16.msra.mxu0 %v1688_v11  ;;  %v2413_v7 = vld [vmem:[#allocation11 + $0x60] sm:$0xff]  ;;  %v2724_v11 = vld [vmem:[#allocation10] sm:$0xf] }
  0xdd   :  { %1191 = vmatpush.bf16.msra.mxu1 %v1816_v12  ;;  %v2410_v12 = vld [vmem:[#allocation11 + $0x48] sm:$0xff]  ;;  %v370_v16 = vperm.slane %v2724_v11, 0  ;;  %v372_v57 = vperm.slane %v2724_v11, 2 }
  0xdf   :  { %1203 = vmatpush.bf16.msra.mxu2 %v1960_v19 }
  0xe0   :  { %1216 = vmatpush.bf16.msra.mxu3 %v2088_v20  ;;  %1179 = vmatpush.bf16.msra.mxu0 %v1672_v23  ;;  %v2420_v20 = vld [vmem:[#allocation11 + $0x98] sm:$0xff] }
  0xe1   :  { %1192 = vmatpush.bf16.msra.mxu1 %v1800_v24  ;;  %v2419_v24 = vld [vmem:[#allocation11 + $0x90] sm:$0xff] }
  0xe3   :  { %1204 = vmatpush.bf16.msra.mxu2 %v1944_v31 }
  0xe4   :  { %1217 = vmatpush.bf16.msra.mxu3 %v2072_v32  ;;  %1180 = vmatpush.bf16.msra.mxu0 %v1656_v35 }
  0xe5   :  { %1193 = vmatpush.bf16.msra.mxu1 %v1784_v36  ;;  %v371_v36 = vperm.slane %v2724_v11, 1 }
  0xe7   :  { %1205 = vmatpush.bf16.msra.mxu2 %v1928_v44  ;;  %v2430_v44 = vld [vmem:[#allocation11 + $0xe8] sm:$0xff] }
  0xe8   :  { %1218 = vmatpush.bf16.msra.mxu3 %v2056_v45  ;;  %1181 = vmatpush.bf16.msra.mxu0 %v1640_v49 }
  0xe9   :  { %1194 = vmatpush.bf16.msra.mxu1 %v1768_v50  ;;  %v2429_v50 = vld [vmem:[#allocation11 + $0xe0] sm:$0xff] }
  0xeb   :  { %1206 = vmatpush.bf16.msra.mxu2 %v1912_v54  ;;  %1182 = vmatmul.bf16.vlgmr.msra.gmra.mxu0 %v2700_v41  ;;  %v2415_v41 = vld [vmem:[#allocation11 + $0x70] sm:$0xff] }
  0xec   :  { %1494 = vmatpush.bf16.msrb.mxu0 %v2408_v53  ;;  %1219 = vmatpush.bf16.msra.mxu3 %v2040_v55  ;;  %v2428_v53 = vld [vmem:[#allocation11 + $0xd8] sm:$0xff] }
  0xed   :  { %1195 = vmatmul.bf16.vlgmr.msra.gmra.mxu1 %v2702_v46  ;;  %v2402_v46 = vld [vmem:[#allocation11 + $0x8] sm:$0xff] }
  0xee   :  { %1507 = vmatpush.bf16.msrb.mxu1 %v2416_v1 }
  0xef   :  { %1207 = vmatpush.bf16.msra.mxu2 %v1896_v61 }
  0xf0   :  { %1495 = vmatpush.bf16.msrb.mxu0 %v2407_v60  ;;  %1220 = vmatpush.bf16.msra.mxu3 %v2024_v62  ;;  %v2427_v60 = vld [vmem:[#allocation11 + $0xd0] sm:$0xff] }
  0xf2   :  { %1208 = vmatmul.bf16.vlgmr.msra.gmra.mxu2 %v2706_v4  ;;  %1508 = vmatpush.bf16.msrb.mxu1 %v2415_v41  ;;  %v2412_v4 = vld [vmem:[#allocation11 + $0x58] sm:$0xff] }
  0xf3   :  { %1221 = vmatmul.bf16.vlgmr.msra.gmra.mxu3 %v2708_v10  ;;  %v2424_v10 = vld [vmem:[#allocation11 + $0xb8] sm:$0xff] }
  0xf4   :  { %1496 = vmatpush.bf16.msrb.mxu0 %v2406_v63  ;;  %1520 = vmatpush.bf16.msrb.mxu2 %v2424_v10 }
  0xf5   :  { %1533 = vmatpush.bf16.msrb.mxu3 %v2432_v34 }
  0xf6   :  { %1509 = vmatpush.bf16.msrb.mxu1 %v2414_v5 }
  0xf8   :  { %1497 = vmatpush.bf16.msrb.mxu0 %v2405_v0  ;;  %1521 = vmatpush.bf16.msrb.mxu2 %v2423_v9  ;;  %v2426_v0 = vld [vmem:[#allocation11 + $0xc8] sm:$0xff] }
  0xf9   :  { %1534 = vmatpush.bf16.msrb.mxu3 %v2431_v39 }
  0xfa   :  { %1510 = vmatpush.bf16.msrb.mxu1 %v2413_v7 }
  0xfc   :  { %1498 = vmatpush.bf16.msrb.mxu0 %v2404_v2  ;;  %1522 = vmatpush.bf16.msrb.mxu2 %v2422_v13 }
  0xfd   :  { %1535 = vmatpush.bf16.msrb.mxu3 %v2430_v44 }
  0xfe   :  { %1511 = vmatpush.bf16.msrb.mxu1 %v2412_v4 }
 0x100   :  { %1499 = vmatpush.bf16.msrb.mxu0 %v2403_v3  ;;  %1523 = vmatpush.bf16.msrb.mxu2 %v2421_v18 }
 0x101   :  { %1536 = vmatpush.bf16.msrb.mxu3 %v2429_v50 }
 0x102   :  { %1512 = vmatpush.bf16.msrb.mxu1 %v2411_v8 }
 0x104   :  { %1500 = vmatpush.bf16.msrb.mxu0 %v2402_v46  ;;  %1524 = vmatpush.bf16.msrb.mxu2 %v2420_v20  ;;  %v2425_v46 = vld [vmem:[#allocation11 + $0xc0] sm:$0xff] }
 0x105   :  { %1537 = vmatpush.bf16.msrb.mxu3 %v2428_v53 }
 0x106   :  { %1513 = vmatpush.bf16.msrb.mxu1 %v2410_v12  ;;  %v373_v12 = vperm.slane %v2724_v11, 3  ;;  %v2444_v11 = vld [vmem:[%s2742_s6] ss:$0 sm:$0xff]  ;;  %s2637_s6 = smov [#allocation13]  }
 0x107   :  { %s1574_s8 = sshll.u32 %s2637_s6, 4  ;;  %s1575_s8 = int_to_ptr.vmem [resolvable:$true] %s1574_s8 }
 0x108   :  { %1501 = vmatpush.bf16.msrb.mxu0 %v2401_v6  ;;  %1525 = vmatpush.bf16.msrb.mxu2 %v2419_v24 }
 0x109   :  { %1538 = vmatpush.bf16.msrb.mxu3 %v2427_v60 }
 0x10a   :  { %1514 = vmatpush.bf16.msrb.mxu1 %v2409_v17 }
 0x10c   :  { %1526 = vmatpush.bf16.msrb.mxu2 %v2418_v28 }
 0x10d   :  { %1539 = vmatpush.bf16.msrb.mxu3 %v2426_v0 }
 0x110   :  { %1527 = vmatpush.bf16.msrb.mxu2 %v2417_v33 }
 0x111   :  { %1540 = vmatpush.bf16.msrb.mxu3 %v2425_v46 }
 0x127   :  { %v1027_v14 = vpop.f32.mrf.mxu0 }
 0x128   :  { %v1040_v15 = vpop.f32.mrf.mxu1  ;;  %v1028_v19 = vadd.f32 %v1027_v14, %v370_v16 }
 0x12a   :  { %v1041_v23 = vadd.f32 %v1040_v15, %v1028_v19 }
 0x12f   :  { %v1029_v21 = vpop.f32.mrf.mxu0 }
 0x130   :  { %v1042_v22 = vpop.f32.mrf.mxu1 }
 0x135   :  { %v1053_v25 = vpop.f32.mrf.mxu2 }
 0x136   :  { %v1054_v26 = vadd.f32 %v1053_v25, %v1041_v23  ;;  %v1066_v27 = vpop.f32.mrf.mxu3 }
 0x137   :  { %v1079_v30 = vpop.f32.mrf.mxu0 }
 0x138   :  { %v1067_v29 = vadd.f32 %v1066_v27, %v1054_v26  ;;  %v1092_v31 = vpop.f32.mrf.mxu1  ;;  %v1080_v40 = vadd.f32 %v1079_v30, %v371_v36 }
 0x13a   :  { %v1226_v32 = vmax.f32 %v1067_v29, 0.0  ;;  %v1093_v45 = vadd.f32 %v1092_v31, %v1080_v40 }
 0x13c   :  { %v1230_v35 = vpack.c.bf16 %v1226_v32, %v1226_v32 }
 0x13d   :  { %v1055_v37 = vpop.f32.mrf.mxu2 }
 0x13e   :  { %v1068_v38 = vpop.f32.mrf.mxu3  ;;  %1502 = vmatmul.bf16.vlgmr.msrb.gmra.mxu0 %v1230_v35 }
 0x13f   :  { %v1081_v42 = vpop.f32.mrf.mxu0 }
 0x140   :  { %v1094_v43 = vpop.f32.mrf.mxu1 }
 0x145   :  { %v1105_v47 = vpop.f32.mrf.mxu2 }
 0x146   :  { %v1106_v48 = vadd.f32 %v1105_v47, %v1093_v45  ;;  %v1118_v49 = vpop.f32.mrf.mxu3 }
 0x148   :  { %v1119_v51 = vadd.f32 %v1118_v49, %v1106_v48  ;;  %v1131_v52 = vpop.f32.mrf.mxu0 }
 0x149   :  { %v1132_v61 = vadd.f32 %v1131_v52, %v372_v57 }
 0x14a   :  { %v1227_v54 = vmax.f32 %v1119_v51, 0.0 }
 0x14b   :  { %v1144_v55 = vpop.f32.mrf.mxu1 }
 0x14c   :  { %v1231_v56 = vpack.c.bf16 %v1227_v54, %v1227_v54  ;;  %v1145_v1 = vadd.f32 %v1144_v55, %v1132_v61 }
 0x14d   :  { %v1107_v58 = vpop.f32.mrf.mxu2 }
 0x14e   :  { %v1120_v59 = vpop.f32.mrf.mxu3  ;;  %1515 = vmatmul.bf16.vlgmr.msrb.gmra.mxu1 %v1231_v56 }
 0x150   :  { %v1133_v62 = vpop.f32.mrf.mxu0 }
 0x153   :  { %v1146_v63 = vpop.f32.mrf.mxu1 }
 0x155   :  { %v1157_v2 = vpop.f32.mrf.mxu2 }
 0x156   :  { %v1170_v3 = vpop.f32.mrf.mxu3  ;;  %v1158_v41 = vadd.f32 %v1157_v2, %v1145_v1 }
 0x158   :  { %v1171_v5 = vadd.f32 %v1170_v3, %v1158_v41 }
 0x15a   :  { %v1228_v6 = vmax.f32 %v1171_v5, 0.0 }
 0x15c   :  { %v1232_v7 = vpack.c.bf16 %v1228_v6, %v1228_v6 }
 0x15d   :  { %v1159_v4 = vpop.f32.mrf.mxu2 }
 0x15e   :  { %v1172_v10 = vpop.f32.mrf.mxu3  ;;  %1528 = vmatmul.bf16.vlgmr.msrb.gmra.mxu2 %v1232_v7 }
 0x168   :  { %v1183_v8 = vpop.f32.mrf.mxu0 }
 0x169   :  { %v1184_v13 = vadd.f32 %v1183_v8, %v373_v12 }
 0x16a   :  { %v1196_v9 = vpop.f32.mrf.mxu1 }
 0x16b   :  { %v1197_v16 = vadd.f32 %v1196_v9, %v1184_v13 }
 0x170   :  { %v1185_v14 = vpop.f32.mrf.mxu0 }
 0x172   :  { %v1198_v15 = vpop.f32.mrf.mxu1 }
 0x175   :  { %v1209_v17 = vpop.f32.mrf.mxu2 }
 0x176   :  { %v1210_v18 = vadd.f32 %v1209_v17, %v1197_v16  ;;  %v1222_v19 = vpop.f32.mrf.mxu3 }
 0x178   :  { %v1223_v20 = vadd.f32 %v1222_v19, %v1210_v18 }
 0x17a   :  { %v1229_v21 = vmax.f32 %v1223_v20, 0.0 }
 0x17c   :  { %v1233_v22 = vpack.c.bf16 %v1229_v21, %v1229_v21 }
 0x17d   :  { %v1211_v23 = vpop.f32.mrf.mxu2 }
 0x17e   :  { %v1224_v24 = vpop.f32.mrf.mxu3  ;;  %1541 = vmatmul.bf16.vlgmr.msrb.gmra.mxu3 %v1233_v22 }
 0x1bb   :  { %v1503_v25 = vpop.f32.mrf.mxu0 }
 0x1bc   :  { %v1504_v31 = vadd.f32 %v2444_v11, %v1503_v25 }
 0x1c3   :  { %v1505_v26 = vpop.f32.mrf.mxu0 }
 0x1cb   :  { %v1516_v27 = vpop.f32.mrf.mxu1 }
 0x1cc   :  { %v1517_v32 = vadd.f32 %v1516_v27, %v1504_v31 }
 0x1d3   :  { %v1518_v28 = vpop.f32.mrf.mxu1 }
 0x1e1   :  { %v1529_v29 = vpop.f32.mrf.mxu2 }
 0x1e2   :  { %v1530_v33 = vadd.f32 %v1529_v29, %v1517_v32 }
 0x1e9   :  { %v1531_v30 = vpop.f32.mrf.mxu2 }
 0x201   :  { %v1542_v34 = vpop.f32.mrf.mxu3 }
 0x202   :  { %v1543_v35 = vadd.f32 %v1542_v34, %v1530_v33 }
 0x204   :  { %1546 = vmax.xlane.f32.xlu0 %v1543_v35 }
 0x209   :  { %v1544_v36 = vpop.f32.mrf.mxu3 }
 0x277   :  { %v1547_v37 = vpop.xlane.xlu0 %1546 }
 0x278   :  { %v1548_v38 = vsub.f32 %v1543_v35, %v1547_v37 }
 0x27a   :  { %v1549_v39 = vmul.f32 1.442695, %v1548_v38 }
 0x27c   :  { %2445 = vpow2.f32 %v1549_v39 }
 0x282   :  { %v2446_v40 = vpop.eup %2445 }
 0x283   :  { %1551 = vadd.xlane.f32.xlu0 %v2446_v40 }
 0x2f6   :  { %v1552_v42 = vpop.xlane.xlu0 %1551 }
 0x2f7   :  { %2447 = vrcp.f32 %v1552_v42  ;;  %v1564_v47 = vand.u32 2147483648, %v1552_v42  ;;  %v1562_v49 = vand.u32 2147483647, %v1552_v42  ;;  %vm1558_vm2 = vweird.f32 %v1552_v42 }
 0x2f9   :  { %v1565_v51 = vor.u32 1.1754944e-38, %v1564_v47  ;;  %vm1563_vm4 = vcmp.eq.f32.partialorder %v1562_v49, 8.507059e+37 }
 0x2fd   :  { %v2448_v43 = vpop.eup %2447 }
 0x2fe   :  { %v1554_v44 = vmul.f32 %v2448_v43, %v1552_v42  ;;  %vm1559_vm1 = vweird.f32 %v2448_v43 }
 0x2ff   :  { %vm1560_vm3 = vmor %vm1558_vm2, %vm1559_vm1 }
 0x300   :  { %v1555_v45 = vsub.f32 1.0, %v1554_v44 }
 0x302   :  { %v1556_v48 = vmul.f32 %v2448_v43, %v1555_v45 }
 0x304   :  { %v1557_v50 = vadd.f32 %v2448_v43, %v1556_v48 }
 0x306   :  { %v1561_v52 = vsel %vm1560_vm3, %v2448_v43, %v1557_v50 }
 0x307   :  { %v1566_v53 = vsel %vm1563_vm4, %v1565_v51, %v1561_v52 }
 0x308   :  { %v1567_v54 = vmul.f32 %v2446_v40, %v1566_v53 }
 0x30a   :  { %1568 = vst [vmem:[#allocation13] sm:$0xff] %v1567_v54 }
 0x30b   :  { %1579 = dma.vmem_to_hbm [thread:$0]  %s1575_s8, 128, %s1577_s11, [#allocation4]  }
 0x30c   :  { %2625 = dma.done.wait [#allocation4], 128  }
 0x30d   :  { %2626 = vsyncadd [#allocation4], 4294967168 }
 0x30e   :  { %1584 = vsyncpa [#allocation3], 1 }
 0x30f   :  { %1585 = vsyncpa [#allocation6], 1 }
 0x310   :  { %1586 = vsyncpa [#allocation9], 1 }
 0x311   :  { %1587 = vsyncpa [#allocation12], 1 }
 0x312   :  { %1588 = vsyncpa [#allocation4], 1 }

// kernel: tpu_custom_call.1
= control target key start
LH: loop header
LB: loop body
LE: loop exit
PB: predicated region body
PF: predicated region fallthrough
CT: control target
= control target key end

     0   :  { %12 = vsyncpa [#allocation3], 0  ;;  %s2736_s0 = inlined_call_operand.hbm [shape: f32[8,32], index: 0, kind: input, shape index: {}]   ;;  %s2737_s1 = inlined_call_operand.hbm [shape: bf16[32,512], index: 1, kind: input, shape index: {}]   ;;  %s2738_s2 = inlined_call_operand.hbm [shape: f32[1,512], index: 2, kind: input, shape index: {}]   ;;  %s2739_s3 = inlined_call_operand.hbm [shape: bf16[512,512], index: 3, kind: input, shape index: {}]   ;;  %s2740_s4 = inlined_call_operand.hbm [shape: f32[1,512], index: 4, kind: input, shape index: {}]   ;;  %s2741_s5 = inlined_call_operand.hbm [shape: bf16[512,128], index: 5, kind: input, shape index: {}]   ;;  %s2742_s6 = inlined_call_operand.vmem [shape: f32[1,128], index: 6, kind: input, shape index: {}]   ;;  %s2743_s7 = inlined_call_operand.hbm [shape: f32[8,128], index: 7, kind: output, shape index: {}]  }
   0x1   :  { %13 = vsyncpa [#allocation6], 0 }
   0x2   :  { %14 = vsyncpa [#allocation9], 0 }
   0x3   :  { %15 = vsyncpa [#allocation12], 0  ;;  %s32_s26 = sshll.u32 %s2737_s1, 4  ;;  %s33_s26 = int_to_ptr.hbm [resolvable:$true] %s32_s26 }
   0x4   :  { %16 = vsyncpa [#allocation4], 0  ;;  %s2627_s27 = smov [#allocation5]   ;;  %s56_s8 = sshll.u32 %s2739_s3, 4  ;;  %s57_s8 = int_to_ptr.hbm [resolvable:$true] %s56_s8 }
   0x5   :  { %s34_s28 = sshll.u32 %s2627_s27, 4  ;;  %s2628_s9 = smov 256   ;;  %s35_s28 = int_to_ptr.vmem [resolvable:$true] %s34_s28 }
   0x6   :  { %s2629_s10 = smov 16   ;;  %s2630_s11 = smov [#allocation8]  }
   0x7   :  { %40 = dma.hbm_to_vmem [thread:$0]  %s33_s26, 1024, %s35_s28, [#allocation6], %s2628_s9, %s2628_s9, %s2629_s10  }
   0x8   :  { %s58_s12 = sshll.u32 %s2630_s11, 4  ;;  %s22_s15 = sshll.u32 %s2736_s0, 4  ;;  %s59_s12 = int_to_ptr.vmem [resolvable:$true] %s58_s12  ;;  %s23_s15 = int_to_ptr.hbm [resolvable:$true] %s22_s15 }
   0x9   :  { %64 = dma.hbm_to_vmem [thread:$0]  %s57_s8, 16384, %s59_s12, [#allocation9], %s2628_s9, %s2628_s9, %s2629_s10  }
   0xa   :  { %s46_s17 = sshll.u32 %s2738_s2, 4  ;;  %s2631_s18 = smov [#allocation2]   ;;  %s47_s17 = int_to_ptr.hbm [resolvable:$true] %s46_s17 }
   0xb   :  { %s24_s19 = sshll.u32 %s2631_s18, 4  ;;  %s2632_s3 = smov [#allocation7]   ;;  %s25_s19 = int_to_ptr.vmem [resolvable:$true] %s24_s19 }
   0xc   :  { %27 = dma.hbm_to_vmem [thread:$0]  %s23_s15, 128, %s25_s19, [#allocation3]  }
   0xd   :  { %s48_s20 = sshll.u32 %s2632_s3, 4  ;;  %s70_s23 = sshll.u32 %s2740_s4, 4  ;;  %s49_s20 = int_to_ptr.vmem [resolvable:$true] %s48_s20  ;;  %s71_s23 = int_to_ptr.hbm [resolvable:$true] %s70_s23 }
   0xe   :  { %51 = dma.hbm_to_vmem [thread:$0]  %s47_s17, 64, %s49_s20, [#allocation6]  }
   0xf   :  { %s80_s25 = sshll.u32 %s2741_s5, 4  ;;  %s2633_s26 = smov [#allocation10]   ;;  %s81_s25 = int_to_ptr.hbm [resolvable:$true] %s80_s25 }
  0x10   :  { %s72_s2 = sshll.u32 %s2633_s26, 4  ;;  %s2634_s27 = smov [#allocation11]   ;;  %s73_s2 = int_to_ptr.vmem [resolvable:$true] %s72_s2 }
  0x11   :  { %75 = dma.hbm_to_vmem [thread:$0]  %s71_s23, 64, %s73_s2, [#allocation9]  }
  0x12   :  { %s82_s28 = sshll.u32 %s2634_s27, 4  ;;  %s2635_s29 = smov 64   ;;  %s83_s28 = int_to_ptr.vmem [resolvable:$true] %s82_s28 }
  0x13   :  { %s2636_s30 = smov 4  }
  0x14   :  { %88 = dma.hbm_to_vmem [thread:$0]  %s81_s25, 4096, %s83_s28, [#allocation12], %s2635_s29, %s2635_s29, %s2636_s30  }
  0x15   :  { %2617 = dma.done.wait [#allocation3], 128  }
  0x16   :  { %2618 = vsyncadd [#allocation3], 4294967168 }
  0x17   :  { %2619 = dma.done.wait [#allocation6], 1088  }
  0x18   :  { %2620 = vsyncadd [#allocation6], 4294966208 }
  0x19   :  { %2621 = dma.done.wait [#allocation9], 16448  }
  0x1a   :  { %2622 = vsyncadd [#allocation9], 4294950848 }
  0x1b   :  { %2623 = dma.done.wait [#allocation12], 4096  }
  0x1c   :  { %2624 = vsyncadd [#allocation12], 4294963200  ;;  %v1607_v0 = vld [vmem:[#allocation5 + $0x20] sm:$0xf]  ;;  %v2271_v1 = vld [vmem:[#allocation5 + $0x2c] sm:$0xf0] }
  0x1d   :  { %v2269_v2 = vld [vmem:[#allocation5 + $0x24] sm:$0xf]  ;;  %v1608_v3 = vor.u32 %v2271_v1, %v1607_v0  ;;  %v1609_v4 = vld [vmem:[#allocation5 + $0x30] sm:$0xf0]  ;;  %v1615_v5 = vld [vmem:[#allocation5 + $0x28] sm:$0xf] }
  0x1e   :  { %v2272_v6 = vld [vmem:[#allocation5 + $0x34] sm:$0xf0]  ;;  %v1612_v7 = vor.u32 %v2269_v2, %v1609_v4  ;;  %v2270_v9 = vld [vmem:[#allocation5 + $0x2c] sm:$0xf]  ;;  %v1617_v10 = vld [vmem:[#allocation5 + $0x38] sm:$0xf0] }
  0x1f   :  { %v1616_v8 = vor.u32 %v2272_v6, %v1615_v5  ;;  %v1591_v11 = vld [vmem:[#allocation5] sm:$0xf]  ;;  %186 = vmatpush.bf16.msra.mxu0 %v1608_v3  ;;  %v1620_v12 = vor.u32 %v2270_v9, %v1617_v10  ;;  %v2267_v13 = vld [vmem:[#allocation5 + $0xc] sm:$0xf0]  ;;  %v2265_v14 = vld [vmem:[#allocation5 + $0x4] sm:$0xf] }
  0x20   :  { %v1593_v15 = vld [vmem:[#allocation5 + $0x10] sm:$0xf0]  ;;  %199 = vmatpush.bf16.msra.mxu1 %v1612_v7  ;;  %v1592_v16 = vor.u32 %v2267_v13, %v1591_v11  ;;  %v1599_v18 = vld [vmem:[#allocation5 + $0x8] sm:$0xf]  ;;  %v2268_v19 = vld [vmem:[#allocation5 + $0x14] sm:$0xf0] }
  0x21   :  { %212 = vmatpush.bf16.msra.mxu2 %v1616_v8  ;;  %v1596_v17 = vor.u32 %v2265_v14, %v1593_v15  ;;  %v2266_v20 = vld [vmem:[#allocation5 + $0xc] sm:$0xf]  ;;  %225 = vmatpush.bf16.msra.mxu3 %v1620_v12  ;;  %v1600_v21 = vor.u32 %v2268_v19, %v1599_v18  ;;  %v1601_v22 = vld [vmem:[#allocation5 + $0x18] sm:$0xf0]  ;;  %vm176_vm0 = vcmask 261120   ;;  %s1576_s11 = sshll.u32 %s2743_s7, 4  ;;  %s1577_s11 = int_to_ptr.hbm [resolvable:$true] %s1576_s11 }
  0x22   :  { %v116_v23 = vld [vmem:[#allocation2] sm:$0xff]  ;;  %v1739_v24 = vld [vmem:[#allocation8 + $0xe0] sm:$0xf]  ;;  %v1604_v25 = vor.u32 %v2266_v20, %v1601_v22  ;;  %v2303_v27 = vld [vmem:[#allocation8 + $0xec] sm:$0xf0] }
  0x23   :  { %v117_v26 = vpack.c.bf16 %v116_v23, %v116_v23  ;;  %v1867_v28 = vld [vmem:[#allocation8 + $0x1e0] sm:$0xf]  ;;  %v2335_v29 = vld [vmem:[#allocation8 + $0x1ec] sm:$0xf0]  ;;  %187 = vmatpush.bf16.msra.mxu0 %v1592_v16  ;;  %v1740_v30 = vor.u32 %v2303_v27, %v1739_v24 }
  0x24   :  { %v1868_v31 = vor.u32 %v2335_v29, %v1867_v28  ;;  %v1723_v32 = vld [vmem:[#allocation8 + $0xc0] sm:$0xf]  ;;  %v2299_v33 = vld [vmem:[#allocation8 + $0xcc] sm:$0xf0]  ;;  %200 = vmatpush.bf16.msra.mxu1 %v1596_v17 }
  0x25   :  { %v1851_v34 = vld [vmem:[#allocation8 + $0x1c0] sm:$0xf]  ;;  %213 = vmatpush.bf16.msra.mxu2 %v1600_v21  ;;  %v2331_v35 = vld [vmem:[#allocation8 + $0x1cc] sm:$0xf0]  ;;  %226 = vmatpush.bf16.msra.mxu3 %v1604_v25  ;;  %v1724_v38 = vor.u32 %v2299_v33, %v1723_v32 }
  0x26   :  { %v1995_v36 = vld [vmem:[#allocation8 + $0x2e0] sm:$0xf]  ;;  %v2367_v37 = vld [vmem:[#allocation8 + $0x2ec] sm:$0xf0]  ;;  %1621 = vmatmul.msk.bf16.vlgmr.msra.gmra.mxu0 %vm176_vm0, %v117_v26  ;;  %v1852_v43 = vor.u32 %v2331_v35, %v1851_v34 }
  0x27   :  { %1018 = vmatpush.bf16.msrb.mxu0 %v1740_v30  ;;  %v1996_v39 = vor.u32 %v2367_v37, %v1995_v36  ;;  %v2123_v40 = vld [vmem:[#allocation8 + $0x3e0] sm:$0xf]  ;;  %v2399_v41 = vld [vmem:[#allocation8 + $0x3ec] sm:$0xf0]  ;;  %1622 = vmatmul.msk.bf16.vlgmr.msra.gmra.mxu1 %vm176_vm0, %v117_v26 }
  0x28   :  { %v1707_v42 = vld [vmem:[#allocation8 + $0xa0] sm:$0xf]  ;;  %1031 = vmatpush.bf16.msrb.mxu1 %v1868_v31  ;;  %v2124_v44 = vor.u32 %v2399_v41, %v2123_v40  ;;  %v2295_v45 = vld [vmem:[#allocation8 + $0xac] sm:$0xf0]  ;;  %1623 = vmatmul.msk.bf16.vlgmr.msra.gmra.mxu2 %vm176_vm0, %v117_v26 }
  0x29   :  { %v1835_v46 = vld [vmem:[#allocation8 + $0x1a0] sm:$0xf]  ;;  %v2327_v47 = vld [vmem:[#allocation8 + $0x1ac] sm:$0xf0]  ;;  %1624 = vmatmul.msk.bf16.vlgmr.msra.gmra.mxu3 %vm176_vm0, %v117_v26  ;;  %1044 = vmatpush.bf16.msrb.mxu2 %v1996_v39  ;;  %v1708_v53 = vor.u32 %v2295_v45, %v1707_v42 }
  0x2a   :  { %v1979_v48 = vld [vmem:[#allocation8 + $0x2c0] sm:$0xf]  ;;  %v2363_v49 = vld [vmem:[#allocation8 + $0x2cc] sm:$0xf0]  ;;  %1057 = vmatpush.bf16.msrb.mxu3 %v2124_v44  ;;  %v1836_v58 = vor.u32 %v2327_v47, %v1835_v46 }
  0x2b   :  { %v2107_v50 = vld [vmem:[#allocation8 + $0x3c0] sm:$0xf]  ;;  %v1980_v51 = vor.u32 %v2363_v49, %v1979_v48  ;;  %v2395_v52 = vld [vmem:[#allocation8 + $0x3cc] sm:$0xf0]  ;;  %1019 = vmatpush.bf16.msrb.mxu0 %v1724_v38  ;;  %v2301_v48 = vld [vmem:[#allocation8 + $0xe4] sm:$0xf] }
  0x2c   :  { %v2108_v54 = vor.u32 %v2395_v52, %v2107_v50  ;;  %v1691_v55 = vld [vmem:[#allocation8 + $0x80] sm:$0xf]  ;;  %v2291_v56 = vld [vmem:[#allocation8 + $0x8c] sm:$0xf0]  ;;  %1032 = vmatpush.bf16.msrb.mxu1 %v1852_v43  ;;  %v1741_v49 = vld [vmem:[#allocation8 + $0xf0] sm:$0xf0] }
  0x2d   :  { %v1963_v57 = vld [vmem:[#allocation8 + $0x2a0] sm:$0xf]  ;;  %v2359_v59 = vld [vmem:[#allocation8 + $0x2ac] sm:$0xf0]  ;;  %1045 = vmatpush.bf16.msrb.mxu2 %v1980_v51  ;;  %v1692_v1 = vor.u32 %v2291_v56, %v1691_v55  ;;  %v2333_v50 = vld [vmem:[#allocation8 + $0x1e4] sm:$0xf] }
  0x2e   :  { %v2091_v60 = vld [vmem:[#allocation8 + $0x3a0] sm:$0xf]  ;;  %v2391_v61 = vld [vmem:[#allocation8 + $0x3ac] sm:$0xf0]  ;;  %v1964_v0 = vor.u32 %v2359_v59, %v1963_v57  ;;  %1058 = vmatpush.bf16.msrb.mxu3 %v2108_v54  ;;  %v1869_v51 = vld [vmem:[#allocation8 + $0x1f0] sm:$0xf0] }
  0x2f   :  { %v1819_v62 = vld [vmem:[#allocation8 + $0x180] sm:$0xf]  ;;  %v2323_v63 = vld [vmem:[#allocation8 + $0x18c] sm:$0xf0]  ;;  %1020 = vmatpush.bf16.msrb.mxu0 %v1708_v53  ;;  %v2092_v2 = vor.u32 %v2391_v61, %v2091_v60  ;;  %v2297_v55 = vld [vmem:[#allocation8 + $0xc4] sm:$0xf]  ;;  %v1744_v60 = vor.u32 %v2301_v48, %v1741_v49 }
  0x30   :  { %v1675_v3 = vld [vmem:[#allocation8 + $0x60] sm:$0xf]  ;;  %v2355_v5 = vld [vmem:[#allocation8 + $0x28c] sm:$0xf0]  ;;  %1033 = vmatpush.bf16.msrb.mxu1 %v1836_v58  ;;  %v1820_v6 = vor.u32 %v2323_v63, %v1819_v62  ;;  %v2365_v62 = vld [vmem:[#allocation8 + $0x2e4] sm:$0xf] }
  0x31   :  { %v1947_v4 = vld [vmem:[#allocation8 + $0x280] sm:$0xf]  ;;  %v2287_v7 = vld [vmem:[#allocation8 + $0x6c] sm:$0xf0]  ;;  %1046 = vmatpush.bf16.msrb.mxu2 %v1964_v0  ;;  %v1997_v63 = vld [vmem:[#allocation8 + $0x2f0] sm:$0xf0]  ;;  %v1872_v0 = vor.u32 %v2333_v50, %v1869_v51 }
  0x32   :  { %v2075_v8 = vld [vmem:[#allocation8 + $0x380] sm:$0xf]  ;;  %v2387_v9 = vld [vmem:[#allocation8 + $0x38c] sm:$0xf0]  ;;  %v1948_v12 = vor.u32 %v2355_v5, %v1947_v4  ;;  %1059 = vmatpush.bf16.msrb.mxu3 %v2092_v2  ;;  %v1676_v13 = vor.u32 %v2287_v7, %v1675_v3  ;;  %v2397_v2 = vld [vmem:[#allocation8 + $0x3e4] sm:$0xf] }
  0x33   :  { %v1803_v10 = vld [vmem:[#allocation8 + $0x160] sm:$0xf]  ;;  %v2319_v11 = vld [vmem:[#allocation8 + $0x16c] sm:$0xf0]  ;;  %1021 = vmatpush.bf16.msrb.mxu0 %v1692_v1  ;;  %v2076_v14 = vor.u32 %v2387_v9, %v2075_v8  ;;  %v1725_v1 = vld [vmem:[#allocation8 + $0xd0] sm:$0xf0]  ;;  %v2000_v8 = vor.u32 %v2365_v62, %v1997_v63 }
  0x34   :  { %v1659_v15 = vld [vmem:[#allocation8 + $0x40] sm:$0xf]  ;;  %v2351_v17 = vld [vmem:[#allocation8 + $0x26c] sm:$0xf0]  ;;  %1034 = vmatpush.bf16.msrb.mxu1 %v1820_v6  ;;  %v1804_v18 = vor.u32 %v2319_v11, %v1803_v10  ;;  %v2125_v3 = vld [vmem:[#allocation8 + $0x3f0] sm:$0xf0]  ;;  %v1728_v9 = vor.u32 %v2297_v55, %v1725_v1 }
  0x35   :  { %v1931_v16 = vld [vmem:[#allocation8 + $0x260] sm:$0xf]  ;;  %v2283_v19 = vld [vmem:[#allocation8 + $0x4c] sm:$0xf0]  ;;  %1047 = vmatpush.bf16.msrb.mxu2 %v1948_v12  ;;  %v2329_v4 = vld [vmem:[#allocation8 + $0x1c4] sm:$0xf]  ;;  %v2128_v10 = vor.u32 %v2397_v2, %v2125_v3 }
  0x36   :  { %v2059_v20 = vld [vmem:[#allocation8 + $0x360] sm:$0xf]  ;;  %v2383_v21 = vld [vmem:[#allocation8 + $0x36c] sm:$0xf0]  ;;  %v1932_v24 = vor.u32 %v2351_v17, %v1931_v16  ;;  %1060 = vmatpush.bf16.msrb.mxu3 %v2076_v14  ;;  %v1660_v25 = vor.u32 %v2283_v19, %v1659_v15  ;;  %v1853_v5 = vld [vmem:[#allocation8 + $0x1d0] sm:$0xf0] }
  0x37   :  { %v1787_v22 = vld [vmem:[#allocation8 + $0x140] sm:$0xf]  ;;  %v2315_v23 = vld [vmem:[#allocation8 + $0x14c] sm:$0xf0]  ;;  %1022 = vmatpush.bf16.msrb.mxu0 %v1676_v13  ;;  %v2060_v26 = vor.u32 %v2383_v21, %v2059_v20  ;;  %v2293_v11 = vld [vmem:[#allocation8 + $0xa4] sm:$0xf]  ;;  %v1856_v14 = vor.u32 %v2329_v4, %v1853_v5 }
  0x38   :  { %v1643_v27 = vld [vmem:[#allocation8 + $0x20] sm:$0xf]  ;;  %v2347_v29 = vld [vmem:[#allocation8 + $0x24c] sm:$0xf0]  ;;  %1035 = vmatpush.bf16.msrb.mxu1 %v1804_v18  ;;  %v1788_v30 = vor.u32 %v2315_v23, %v1787_v22  ;;  %v2361_v12 = vld [vmem:[#allocation8 + $0x2c4] sm:$0xf] }
  0x39   :  { %v1915_v28 = vld [vmem:[#allocation8 + $0x240] sm:$0xf]  ;;  %v2279_v31 = vld [vmem:[#allocation8 + $0x2c] sm:$0xf0]  ;;  %1048 = vmatpush.bf16.msrb.mxu2 %v1932_v24  ;;  %v1981_v13 = vld [vmem:[#allocation8 + $0x2d0] sm:$0xf0] }
  0x3a   :  { %v2043_v32 = vld [vmem:[#allocation8 + $0x340] sm:$0xf]  ;;  %v2379_v33 = vld [vmem:[#allocation8 + $0x34c] sm:$0xf0]  ;;  %v1916_v36 = vor.u32 %v2347_v29, %v1915_v28  ;;  %1061 = vmatpush.bf16.msrb.mxu3 %v2060_v26  ;;  %v1644_v38 = vor.u32 %v2279_v31, %v1643_v27  ;;  %v1709_v15 = vld [vmem:[#allocation8 + $0xb0] sm:$0xf0]  ;;  %v1984_v20 = vor.u32 %v2361_v12, %v1981_v13 }
  0x3b   :  { %v1771_v34 = vld [vmem:[#allocation8 + $0x120] sm:$0xf]  ;;  %v2311_v35 = vld [vmem:[#allocation8 + $0x12c] sm:$0xf0]  ;;  %1023 = vmatpush.bf16.msrb.mxu0 %v1660_v25  ;;  %v2044_v39 = vor.u32 %v2379_v33, %v2043_v32  ;;  %v2393_v16 = vld [vmem:[#allocation8 + $0x3c4] sm:$0xf]  ;;  %v1712_v21 = vor.u32 %v2293_v11, %v1709_v15 }
  0x3c   :  { %v1627_v37 = vld [vmem:[#allocation8] sm:$0xf]  ;;  %v2275_v40 = vld [vmem:[#allocation8 + $0xc] sm:$0xf0]  ;;  %1036 = vmatpush.bf16.msrb.mxu1 %v1788_v30  ;;  %v1772_v43 = vor.u32 %v2311_v35, %v1771_v34  ;;  %v2109_v17 = vld [vmem:[#allocation8 + $0x3d0] sm:$0xf0] }
  0x3d   :  { %v1899_v41 = vld [vmem:[#allocation8 + $0x220] sm:$0xf]  ;;  %v2343_v42 = vld [vmem:[#allocation8 + $0x22c] sm:$0xf0]  ;;  %1049 = vmatpush.bf16.msrb.mxu2 %v1916_v36  ;;  %v1628_v53 = vor.u32 %v2275_v40, %v1627_v37  ;;  %v2325_v18 = vld [vmem:[#allocation8 + $0x1a4] sm:$0xf]  ;;  %v2112_v22 = vor.u32 %v2393_v16, %v2109_v17 }
  0x3e   :  { %v1755_v44 = vld [vmem:[#allocation8 + $0x100] sm:$0xf]  ;;  %v2375_v46 = vld [vmem:[#allocation8 + $0x32c] sm:$0xf0]  ;;  %v1900_v52 = vor.u32 %v2343_v42, %v1899_v41  ;;  %1062 = vmatpush.bf16.msrb.mxu3 %v2044_v39  ;;  %v1837_v19 = vld [vmem:[#allocation8 + $0x1b0] sm:$0xf0] }
  0x3f   :  { %v2027_v45 = vld [vmem:[#allocation8 + $0x320] sm:$0xf]  ;;  %v2307_v47 = vld [vmem:[#allocation8 + $0x10c] sm:$0xf0]  ;;  %1024 = vmatpush.bf16.msrb.mxu0 %v1644_v38  ;;  %v2289_v23 = vld [vmem:[#allocation8 + $0x84] sm:$0xf]  ;;  %v1840_v26 = vor.u32 %v2325_v18, %v1837_v19 }
  0x40   :  { %v2028_v54 = vor.u32 %v2375_v46, %v2027_v45  ;;  %v1883_v56 = vld [vmem:[#allocation8 + $0x200] sm:$0xf]  ;;  %v2339_v57 = vld [vmem:[#allocation8 + $0x20c] sm:$0xf0]  ;;  %1037 = vmatpush.bf16.msrb.mxu1 %v1772_v43  ;;  %v1756_v59 = vor.u32 %v2307_v47, %v1755_v44  ;;  %v2357_v24 = vld [vmem:[#allocation8 + $0x2a4] sm:$0xf] }
  0x41   :  { %v2011_v58 = vld [vmem:[#allocation8 + $0x300] sm:$0xf]  ;;  %v2371_v61 = vld [vmem:[#allocation8 + $0x30c] sm:$0xf0]  ;;  %1050 = vmatpush.bf16.msrb.mxu2 %v1900_v52  ;;  %v1884_v6 = vor.u32 %v2339_v57, %v1883_v56  ;;  %v1965_v25 = vld [vmem:[#allocation8 + $0x2b0] sm:$0xf0] }
  0x42   :  { %1063 = vmatpush.bf16.msrb.mxu3 %v2028_v54  ;;  %v2012_v7 = vor.u32 %v2371_v61, %v2011_v58  ;;  %v1693_v27 = vld [vmem:[#allocation8 + $0x90] sm:$0xf0]  ;;  %v2389_v28 = vld [vmem:[#allocation8 + $0x3a4] sm:$0xf]  ;;  %v1968_v32 = vor.u32 %v2357_v24, %v1965_v25 }
  0x43   :  { %1025 = vmatpush.bf16.msrb.mxu0 %v1628_v53  ;;  %v2093_v29 = vld [vmem:[#allocation8 + $0x3b0] sm:$0xf0]  ;;  %v2321_v30 = vld [vmem:[#allocation8 + $0x184] sm:$0xf]  ;;  %v1696_v33 = vor.u32 %v2289_v23, %v1693_v27 }
  0x44   :  { %1038 = vmatpush.bf16.msrb.mxu1 %v1756_v59  ;;  %v1821_v31 = vld [vmem:[#allocation8 + $0x190] sm:$0xf0]  ;;  %v2096_v34 = vor.u32 %v2389_v28, %v2093_v29  ;;  %v2285_v35 = vld [vmem:[#allocation8 + $0x64] sm:$0xf] }
  0x45   :  { %1051 = vmatpush.bf16.msrb.mxu2 %v1884_v6  ;;  %v2353_v36 = vld [vmem:[#allocation8 + $0x284] sm:$0xf]  ;;  %v1949_v37 = vld [vmem:[#allocation8 + $0x290] sm:$0xf0]  ;;  %v1824_v38 = vor.u32 %v2321_v30, %v1821_v31 }
  0x46   :  { %1064 = vmatpush.bf16.msrb.mxu3 %v2012_v7  ;;  %v1677_v39 = vld [vmem:[#allocation8 + $0x70] sm:$0xf0]  ;;  %v2385_v40 = vld [vmem:[#allocation8 + $0x384] sm:$0xf]  ;;  %v1952_v44 = vor.u32 %v2353_v36, %v1949_v37  ;;  %v2336_v36 = vld [vmem:[#allocation8 + $0x1f4] sm:$0xf0] }
  0x47   :  { %1070 = vmatpush.bf16.msra.mxu0 %v1744_v60  ;;  %v2077_v41 = vld [vmem:[#allocation8 + $0x390] sm:$0xf0]  ;;  %v2317_v42 = vld [vmem:[#allocation8 + $0x164] sm:$0xf]  ;;  %v1680_v45 = vor.u32 %v2285_v35, %v1677_v39  ;;  %v1875_v35 = vld [vmem:[#allocation8 + $0x1e8] sm:$0xf] }
  0x48   :  { %1083 = vmatpush.bf16.msra.mxu1 %v1872_v0  ;;  %v1805_v43 = vld [vmem:[#allocation8 + $0x170] sm:$0xf0]  ;;  %v2080_v46 = vor.u32 %v2385_v40, %v2077_v41  ;;  %v2281_v48 = vld [vmem:[#allocation8 + $0x44] sm:$0xf] }
  0x49   :  { %1096 = vmatpush.bf16.msra.mxu2 %v2000_v8  ;;  %v1808_v47 = vor.u32 %v2317_v42, %v1805_v43  ;;  %v1661_v49 = vld [vmem:[#allocation8 + $0x50] sm:$0xf0]  ;;  %v2313_v50 = vld [vmem:[#allocation8 + $0x144] sm:$0xf]  ;;  %v1876_v43 = vor.u32 %v2336_v36, %v1875_v35 }
  0x4a   :  { %1109 = vmatpush.bf16.msra.mxu3 %v2128_v10  ;;  %v1789_v51 = vld [vmem:[#allocation8 + $0x150] sm:$0xf0]  ;;  %v1664_v52 = vor.u32 %v2281_v48, %v1661_v49  ;;  %v2349_v54 = vld [vmem:[#allocation8 + $0x264] sm:$0xf]  ;;  %v2332_v48 = vld [vmem:[#allocation8 + $0x1d4] sm:$0xf0] }
  0x4b   :  { %1071 = vmatpush.bf16.msra.mxu0 %v1728_v9  ;;  %v1792_v53 = vor.u32 %v2313_v50, %v1789_v51  ;;  %v1933_v55 = vld [vmem:[#allocation8 + $0x270] sm:$0xf0]  ;;  %v2381_v56 = vld [vmem:[#allocation8 + $0x364] sm:$0xf] }
  0x4c   :  { %1084 = vmatpush.bf16.msra.mxu1 %v1856_v14  ;;  %v1936_v57 = vor.u32 %v2349_v54, %v1933_v55  ;;  %v2061_v58 = vld [vmem:[#allocation8 + $0x370] sm:$0xf0]  ;;  %v2277_v60 = vld [vmem:[#allocation8 + $0x24] sm:$0xf]  ;;  %v2003_v54 = vld [vmem:[#allocation8 + $0x2e8] sm:$0xf] }
  0x4d   :  { %1097 = vmatpush.bf16.msra.mxu2 %v1984_v20  ;;  %v2064_v59 = vor.u32 %v2381_v56, %v2061_v58  ;;  %v1645_v61 = vld [vmem:[#allocation8 + $0x30] sm:$0xf0]  ;;  %v2309_v63 = vld [vmem:[#allocation8 + $0x124] sm:$0xf]  ;;  %v2368_v55 = vld [vmem:[#allocation8 + $0x2f4] sm:$0xf0] }
  0x4e   :  { %1110 = vmatpush.bf16.msra.mxu3 %v2112_v22  ;;  %v1648_v62 = vor.u32 %v2277_v60, %v1645_v61  ;;  %v1773_v0 = vld [vmem:[#allocation8 + $0x130] sm:$0xf0]  ;;  %v2345_v2 = vld [vmem:[#allocation8 + $0x244] sm:$0xf]  ;;  %v2131_v56 = vld [vmem:[#allocation8 + $0x3e8] sm:$0xf] }
  0x4f   :  { %1072 = vmatpush.bf16.msra.mxu0 %v1712_v21  ;;  %v1776_v1 = vor.u32 %v2309_v63, %v1773_v0  ;;  %v1917_v3 = vld [vmem:[#allocation8 + $0x250] sm:$0xf0]  ;;  %v2377_v4 = vld [vmem:[#allocation8 + $0x344] sm:$0xf]  ;;  %v2400_v60 = vld [vmem:[#allocation8 + $0x3f4] sm:$0xf0] }
  0x50   :  { %1085 = vmatpush.bf16.msra.mxu1 %v1840_v26  ;;  %v1920_v5 = vor.u32 %v2345_v2, %v1917_v3  ;;  %v2045_v6 = vld [vmem:[#allocation8 + $0x350] sm:$0xf0]  ;;  %v2273_v8 = vld [vmem:[#allocation8 + $0x4] sm:$0xf]  ;;  %v126_v26 = vld [vmem:[#allocation7] sm:$0xf]  ;;  %v2004_v3 = vor.u32 %v2368_v55, %v2003_v54 }
  0x51   :  { %1098 = vmatpush.bf16.msra.mxu2 %v1968_v32  ;;  %v2048_v7 = vor.u32 %v2377_v4, %v2045_v6  ;;  %v1629_v9 = vld [vmem:[#allocation8 + $0x10] sm:$0xf0]  ;;  %v2305_v10 = vld [vmem:[#allocation8 + $0x104] sm:$0xf]  ;;  %v128_v27 = vperm.slane %v126_v26, 0  ;;  %v129_v28 = vperm.slane %v126_v26, 1 }
  0x52   :  { %1111 = vmatpush.bf16.msra.mxu3 %v2096_v34  ;;  %v1632_v11 = vor.u32 %v2273_v8, %v1629_v9  ;;  %v1757_v12 = vld [vmem:[#allocation8 + $0x110] sm:$0xf0]  ;;  %v2341_v14 = vld [vmem:[#allocation8 + $0x224] sm:$0xf]  ;;  %v1747_v32 = vld [vmem:[#allocation8 + $0xe8] sm:$0xf] }
  0x53   :  { %1073 = vmatpush.bf16.msra.mxu0 %v1696_v33  ;;  %v1760_v13 = vor.u32 %v2305_v10, %v1757_v12  ;;  %v1901_v15 = vld [vmem:[#allocation8 + $0x230] sm:$0xf0]  ;;  %v2373_v17 = vld [vmem:[#allocation8 + $0x324] sm:$0xf]  ;;  %v2304_v33 = vld [vmem:[#allocation8 + $0xf4] sm:$0xf0] }
  0x54   :  { %1086 = vmatpush.bf16.msra.mxu1 %v1824_v38  ;;  %v1904_v16 = vor.u32 %v2341_v14, %v1901_v15  ;;  %v2029_v18 = vld [vmem:[#allocation8 + $0x330] sm:$0xf0]  ;;  %v2337_v20 = vld [vmem:[#allocation8 + $0x204] sm:$0xf]  ;;  %v130_v39 = vperm.slane %v126_v26, 2  ;;  %v1748_v40 = vor.u32 %v2304_v33, %v1747_v32  ;;  %v131_v42 = vperm.slane %v126_v26, 3 }
  0x55   :  { %1099 = vmatpush.bf16.msra.mxu2 %v1952_v44  ;;  %v2032_v19 = vor.u32 %v2373_v17, %v2029_v18  ;;  %v1885_v21 = vld [vmem:[#allocation8 + $0x210] sm:$0xf0]  ;;  %v2369_v23 = vld [vmem:[#allocation8 + $0x304] sm:$0xf]  ;;  %v1731_v44 = vld [vmem:[#allocation8 + $0xc8] sm:$0xf] }
  0x56   :  { %1112 = vmatpush.bf16.msra.mxu3 %v2080_v46  ;;  %v1888_v22 = vor.u32 %v2337_v20, %v1885_v21  ;;  %v2013_v24 = vld [vmem:[#allocation8 + $0x310] sm:$0xf0]  ;;  %v1715_v61 = vld [vmem:[#allocation8 + $0xa8] sm:$0xf]  ;;  %v2364_v8 = vld [vmem:[#allocation8 + $0x2d4] sm:$0xf0] }
  0x57   :  { %1074 = vmatpush.bf16.msra.mxu0 %v1680_v45  ;;  %v2016_v25 = vor.u32 %v2369_v23, %v2013_v24  ;;  %v2300_v45 = vld [vmem:[#allocation8 + $0xd4] sm:$0xf0]  ;;  %v1843_v0 = vld [vmem:[#allocation8 + $0x1a8] sm:$0xf] }
  0x58   :  { %1087 = vmatpush.bf16.msra.mxu1 %v1808_v47  ;;  %v1859_v47 = vld [vmem:[#allocation8 + $0x1c8] sm:$0xf]  ;;  %v2396_v12 = vld [vmem:[#allocation8 + $0x3d4] sm:$0xf0] }
  0x59   :  { %1100 = vmatpush.bf16.msra.mxu2 %v1936_v57  ;;  %v2115_v9 = vld [vmem:[#allocation8 + $0x3c8] sm:$0xf]  ;;  %v2292_v14 = vld [vmem:[#allocation8 + $0x94] sm:$0xf0] }
  0x5a   :  { %1113 = vmatpush.bf16.msra.mxu3 %v2064_v59  ;;  %v1860_v59 = vor.u32 %v2332_v48, %v1859_v47  ;;  %v1827_v15 = vld [vmem:[#allocation8 + $0x188] sm:$0xf]  ;;  %v2116_v20 = vor.u32 %v2396_v12, %v2115_v9  ;;  %v2360_v23 = vld [vmem:[#allocation8 + $0x2b4] sm:$0xf0]  ;;  %v2334_v9 = vld [vmem:[#allocation8 + $0x1ec] sm:$0xf] }
  0x5b   :  { %1075 = vmatpush.bf16.msra.mxu0 %v1664_v52  ;;  %v2392_v26 = vld [vmem:[#allocation8 + $0x3b4] sm:$0xf0]  ;;  %v1955_v33 = vld [vmem:[#allocation8 + $0x288] sm:$0xf] }
  0x5c   :  { %1088 = vmatpush.bf16.msra.mxu1 %v1792_v53  ;;  %v1732_v53 = vor.u32 %v2300_v45, %v1731_v44  ;;  %v1939_v47 = vld [vmem:[#allocation8 + $0x268] sm:$0xf]  ;;  %v2352_v48 = vld [vmem:[#allocation8 + $0x274] sm:$0xf0] }
  0x5d   :  { %1101 = vmatpush.bf16.msra.mxu2 %v1920_v5  ;;  %v2132_v5 = vor.u32 %v2400_v60, %v2131_v56  ;;  %v2280_v54 = vld [vmem:[#allocation8 + $0x34] sm:$0xf0]  ;;  %v1779_v55 = vld [vmem:[#allocation8 + $0x128] sm:$0xf] }
  0x5e   :  { %1114 = vmatpush.bf16.msra.mxu3 %v2048_v7  ;;  %v1987_v7 = vld [vmem:[#allocation8 + $0x2c8] sm:$0xf]  ;;  %v2312_v56 = vld [vmem:[#allocation8 + $0x134] sm:$0xf0] }
  0x5f   :  { %1076 = vmatpush.bf16.msra.mxu0 %v1648_v62  ;;  %v2296_v62 = vld [vmem:[#allocation8 + $0xb4] sm:$0xf0]  ;;  %v1988_v18 = vor.u32 %v2364_v8, %v1987_v7  ;;  %v1749_v8 = vld [vmem:[#allocation8 + $0xf8] sm:$0xf0] }
  0x60   :  { %1089 = vmatpush.bf16.msra.mxu1 %v1776_v1  ;;  %v2328_v1 = vld [vmem:[#allocation8 + $0x1b4] sm:$0xf0]  ;;  %v1716_v6 = vor.u32 %v2296_v62, %v1715_v61  ;;  %v2051_v61 = vld [vmem:[#allocation8 + $0x348] sm:$0xf] }
  0x61   :  { %1102 = vmatpush.bf16.msra.mxu2 %v1904_v16  ;;  %v2324_v16 = vld [vmem:[#allocation8 + $0x194] sm:$0xf0] }
  0x62   :  { %1115 = vmatpush.bf16.msra.mxu3 %v2032_v19  ;;  %v1828_v24 = vor.u32 %v2324_v16, %v1827_v15  ;;  %v2348_v60 = vld [vmem:[#allocation8 + $0x254] sm:$0xf0] }
  0x63   :  { %1077 = vmatpush.bf16.msra.mxu0 %v1632_v11  ;;  %v1844_v11 = vor.u32 %v2328_v1, %v1843_v0  ;;  %v2380_v0 = vld [vmem:[#allocation8 + $0x354] sm:$0xf0]  ;;  %v1635_v1 = vld [vmem:[#allocation8 + $0x8] sm:$0xf] }
  0x64   :  { %1090 = vmatpush.bf16.msra.mxu1 %v1760_v13  ;;  %v1699_v13 = vld [vmem:[#allocation8 + $0x88] sm:$0xf]  ;;  %v2052_v12 = vor.u32 %v2380_v0, %v2051_v61  ;;  %v2101_v0 = vld [vmem:[#allocation8 + $0x3b8] sm:$0xf0] }
  0x65   :  { %1103 = vmatpush.bf16.msra.mxu2 %v1888_v22  ;;  %v1700_v21 = vor.u32 %v2292_v14, %v1699_v13  ;;  %v1971_v22 = vld [vmem:[#allocation8 + $0x2a8] sm:$0xf]  ;;  %v2344_v14 = vld [vmem:[#allocation8 + $0x234] sm:$0xf0] }
  0x66   :  { %1116 = vmatpush.bf16.msra.mxu3 %v2016_v25  ;;  %v2099_v25 = vld [vmem:[#allocation8 + $0x3a8] sm:$0xf] }
  0x67   :  { %v2100_v32 = vor.u32 %v2392_v26, %v2099_v25  ;;  %v1907_v13 = vld [vmem:[#allocation8 + $0x228] sm:$0xf]  ;;  %v1861_v25 = vld [vmem:[#allocation8 + $0x1d8] sm:$0xf0] }
  0xa3   :  { %v189_v29 = vpop.f32.mrf.mxu0 }
  0xa4   :  { %v190_v30 = vadd.f32 %v189_v29, %v128_v27  ;;  %v202_v31 = vpop.f32.mrf.mxu1  ;;  %v1683_v27 = vld [vmem:[#allocation8 + $0x68] sm:$0xf] }
  0xa5   :  { %v203_v34 = vadd.f32 %v202_v31, %v129_v28  ;;  %v2288_v28 = vld [vmem:[#allocation8 + $0x74] sm:$0xf0]  ;;  %v1811_v29 = vld [vmem:[#allocation8 + $0x168] sm:$0xf]  ;;  %v1972_v31 = vor.u32 %v2360_v23, %v1971_v22  ;;  %v1908_v22 = vor.u32 %v2344_v14, %v1907_v13  ;;  %v1733_v23 = vld [vmem:[#allocation8 + $0xd8] sm:$0xf0] }
  0xa6   :  { %v232_v37 = vmax.f32 %v190_v30, 0.0  ;;  %v2320_v30 = vld [vmem:[#allocation8 + $0x174] sm:$0xf0]  ;;  %v1684_v35 = vor.u32 %v2288_v28, %v1683_v27  ;;  %v1891_v27 = vld [vmem:[#allocation8 + $0x208] sm:$0xf] }
  0xa7   :  { %v233_v38 = vmax.f32 %v203_v34, 0.0  ;;  %v2356_v34 = vld [vmem:[#allocation8 + $0x294] sm:$0xf0]  ;;  %v1812_v36 = vor.u32 %v2320_v30, %v1811_v29  ;;  %v2019_v29 = vld [vmem:[#allocation8 + $0x308] sm:$0xf] }
  0xa8   :  { %v2700_v41 = vpack.c.bf16 %v232_v37, %v232_v37  ;;  %v2083_v37 = vld [vmem:[#allocation8 + $0x388] sm:$0xf]  ;;  %v1956_v44 = vor.u32 %v2356_v34, %v1955_v33  ;;  %v2340_v28 = vld [vmem:[#allocation8 + $0x214] sm:$0xf0]  ;;  %v2386_v13 = vld [vmem:[#allocation8 + $0x38c] sm:$0xf] }
  0xa9   :  { %v2702_v46 = vpack.c.bf16 %v233_v38, %v233_v38  ;;  %v2388_v38 = vld [vmem:[#allocation8 + $0x394] sm:$0xf0]  ;;  %v2085_v14 = vld [vmem:[#allocation8 + $0x398] sm:$0xf0] }
  0xaa   :  { %1026 = vmatmul.bf16.vlgmr.msrb.gmra.mxu0 %v2700_v41  ;;  %v2084_v45 = vor.u32 %v2388_v38, %v2083_v37  ;;  %v2372_v30 = vld [vmem:[#allocation8 + $0x314] sm:$0xf0]  ;;  %v2294_v37 = vld [vmem:[#allocation8 + $0xac] sm:$0xf]  ;;  %v1892_v38 = vor.u32 %v2340_v28, %v1891_v27  ;;  %v1653_v28 = vld [vmem:[#allocation8 + $0x38] sm:$0xf0] }
  0xab   :  { %v215_v49 = vpop.f32.mrf.mxu2  ;;  %1039 = vmatmul.bf16.vlgmr.msrb.gmra.mxu1 %v2702_v46  ;;  %1122 = vmatpush.bf16.msrb.mxu0 %v1748_v40  ;;  %v191_v52 = vpop.f32.mrf.mxu0  ;;  %v2284_v40 = vld [vmem:[#allocation8 + $0x54] sm:$0xf0]  ;;  %v2278_v27 = vld [vmem:[#allocation8 + $0x2c] sm:$0xf] }
  0xac   :  { %v216_v50 = vadd.f32 %v215_v49, %v130_v39  ;;  %v228_v51 = vpop.f32.mrf.mxu3  ;;  %1135 = vmatpush.bf16.msrb.mxu1 %v1876_v43  ;;  %v204_v58 = vpop.f32.mrf.mxu1  ;;  %v1667_v39 = vld [vmem:[#allocation8 + $0x48] sm:$0xf]  ;;  %v2316_v43 = vld [vmem:[#allocation8 + $0x154] sm:$0xf0] }
  0xad   :  { %v229_v57 = vadd.f32 %v228_v51, %v131_v42  ;;  %v1795_v42 = vld [vmem:[#allocation8 + $0x148] sm:$0xf]  ;;  %v1668_v49 = vor.u32 %v2284_v40, %v1667_v39  ;;  %v2384_v52 = vld [vmem:[#allocation8 + $0x374] sm:$0xf0]  ;;  %v1717_v39 = vld [vmem:[#allocation8 + $0xb8] sm:$0xf0] }
  0xae   :  { %v234_v63 = vmax.f32 %v216_v50, 0.0  ;;  %v1796_v50 = vor.u32 %v2316_v43, %v1795_v42  ;;  %v2067_v51 = vld [vmem:[#allocation8 + $0x368] sm:$0xf]  ;;  %v2326_v40 = vld [vmem:[#allocation8 + $0x1ac] sm:$0xf]  ;;  %v2020_v43 = vor.u32 %v2372_v30, %v2019_v29 }
  0xaf   :  { %v235_v2 = vmax.f32 %v229_v57, 0.0  ;;  %1123 = vmatpush.bf16.msrb.mxu0 %v1732_v53  ;;  %v1651_v53 = vld [vmem:[#allocation8 + $0x28] sm:$0xf]  ;;  %v1940_v57 = vor.u32 %v2352_v48, %v1939_v47  ;;  %v2068_v58 = vor.u32 %v2384_v52, %v2067_v51  ;;  %v1845_v42 = vld [vmem:[#allocation8 + $0x1b8] sm:$0xf0] }
  0xb0   :  { %v2706_v4 = vpack.c.bf16 %v234_v63, %v234_v63  ;;  %1136 = vmatpush.bf16.msrb.mxu1 %v1860_v59  ;;  %v1923_v59 = vld [vmem:[#allocation8 + $0x248] sm:$0xf]  ;;  %v1652_v62 = vor.u32 %v2280_v54, %v1651_v53  ;;  %v1780_v63 = vor.u32 %v2312_v56, %v1779_v55  ;;  %v2362_v47 = vld [vmem:[#allocation8 + $0x2cc] sm:$0xf]  ;;  %v1989_v48 = vld [vmem:[#allocation8 + $0x2d8] sm:$0xf0] }
  0xb1   :  { %v2708_v10 = vpack.c.bf16 %v235_v2, %v235_v2  ;;  %v2276_v2 = vld [vmem:[#allocation8 + $0x14] sm:$0xf0]  ;;  %v1924_v7 = vor.u32 %v2348_v60, %v1923_v59  ;;  %v2394_v51 = vld [vmem:[#allocation8 + $0x3cc] sm:$0xf]  ;;  %v2117_v52 = vld [vmem:[#allocation8 + $0x3d8] sm:$0xf0] }
  0xb2   :  { %1052 = vmatmul.bf16.vlgmr.msrb.gmra.mxu2 %v2706_v4  ;;  %v1636_v15 = vor.u32 %v2276_v2, %v1635_v1  ;;  %v2290_v53 = vld [vmem:[#allocation8 + $0x8c] sm:$0xf]  ;;  %v1701_v54 = vld [vmem:[#allocation8 + $0x98] sm:$0xf0] }
  0xb3   :  { %1065 = vmatmul.bf16.vlgmr.msrb.gmra.mxu3 %v2708_v10  ;;  %1148 = vmatpush.bf16.msrb.mxu2 %v2004_v3  ;;  %v217_v17 = vpop.f32.mrf.mxu2  ;;  %v1763_v3 = vld [vmem:[#allocation8 + $0x108] sm:$0xf]  ;;  %v2322_v55 = vld [vmem:[#allocation8 + $0x18c] sm:$0xf]  ;;  %v1829_v56 = vld [vmem:[#allocation8 + $0x198] sm:$0xf0]  ;;  %v1704_v61 = vor.u32 %v2290_v53, %v1701_v54 }
  0xb4   :  { %1161 = vmatpush.bf16.msrb.mxu3 %v2132_v5  ;;  %v230_v19 = vpop.f32.mrf.mxu3  ;;  %1124 = vmatpush.bf16.msrb.mxu0 %v1716_v6  ;;  %v2308_v5 = vld [vmem:[#allocation8 + $0x114] sm:$0xf0]  ;;  %v2302_v6 = vld [vmem:[#allocation8 + $0xec] sm:$0xf]  ;;  %v2035_v17 = vld [vmem:[#allocation8 + $0x328] sm:$0xf] }
  0xb5   :  { %1137 = vmatpush.bf16.msrb.mxu1 %v1844_v11  ;;  %v1877_v11 = vld [vmem:[#allocation8 + $0x1f8] sm:$0xf0]  ;;  %v1764_v16 = vor.u32 %v2308_v5, %v1763_v3  ;;  %v1752_v19 = vor.u32 %v2302_v6, %v1749_v8  ;;  %v2358_v59 = vld [vmem:[#allocation8 + $0x2ac] sm:$0xf] }
  0xb6   :  { %v1973_v60 = vld [vmem:[#allocation8 + $0x2b8] sm:$0xf0]  ;;  %v2286_v1 = vld [vmem:[#allocation8 + $0x6c] sm:$0xf] }
  0xb7   :  { %1149 = vmatpush.bf16.msrb.mxu2 %v1988_v18  ;;  %v2376_v18 = vld [vmem:[#allocation8 + $0x334] sm:$0xf0]  ;;  %v1685_v2 = vld [vmem:[#allocation8 + $0x78] sm:$0xf0]  ;;  %v2318_v3 = vld [vmem:[#allocation8 + $0x16c] sm:$0xf]  ;;  %v1976_v6 = vor.u32 %v2358_v59, %v1973_v60 }
  0xb8   :  { %1162 = vmatpush.bf16.msrb.mxu3 %v2116_v20  ;;  %1125 = vmatpush.bf16.msrb.mxu0 %v1700_v21  ;;  %v1880_v20 = vor.u32 %v2334_v9, %v1877_v11  ;;  %v2298_v21 = vld [vmem:[#allocation8 + $0xcc] sm:$0xf]  ;;  %v2036_v26 = vor.u32 %v2376_v18, %v2035_v17  ;;  %v1813_v5 = vld [vmem:[#allocation8 + $0x178] sm:$0xf0]  ;;  %v1688_v11 = vor.u32 %v2286_v1, %v1685_v2  ;;  %v2407_v60 = vld [vmem:[#allocation11 + $0x30] sm:$0xff] }
  0xb9   :  { %1138 = vmatpush.bf16.msrb.mxu1 %v1828_v24  ;;  %v2330_v24 = vld [vmem:[#allocation8 + $0x1cc] sm:$0xf]  ;;  %v1736_v33 = vor.u32 %v2298_v21, %v1733_v23  ;;  %v1957_v9 = vld [vmem:[#allocation8 + $0x298] sm:$0xf0] }
  0xba   :  { %1078 = vmatmul.bf16.vlgmr.msra.gmra.mxu0 %v2700_v41  ;;  %v1864_v34 = vor.u32 %v2330_v24, %v1861_v25  ;;  %v2354_v8 = vld [vmem:[#allocation8 + $0x28c] sm:$0xf]  ;;  %v1797_v18 = vld [vmem:[#allocation8 + $0x158] sm:$0xf0] }
  0xbb   :  { %1150 = vmatpush.bf16.msrb.mxu2 %v1972_v31  ;;  %1091 = vmatmul.bf16.vlgmr.msra.gmra.mxu1 %v2702_v46  ;;  %v2366_v31 = vld [vmem:[#allocation8 + $0x2ec] sm:$0xf]  ;;  %v1781_v30 = vld [vmem:[#allocation8 + $0x138] sm:$0xf0] }
  0xbc   :  { %1163 = vmatpush.bf16.msrb.mxu3 %v2100_v32  ;;  %1126 = vmatpush.bf16.msrb.mxu0 %v1684_v35  ;;  %v2005_v32 = vld [vmem:[#allocation8 + $0x2f8] sm:$0xf0]  ;;  %v2398_v35 = vld [vmem:[#allocation8 + $0x3ec] sm:$0xf] }
  0xbd   :  { %1139 = vmatpush.bf16.msrb.mxu1 %v1812_v36  ;;  %v2133_v36 = vld [vmem:[#allocation8 + $0x3f8] sm:$0xf0]  ;;  %v2314_v17 = vld [vmem:[#allocation8 + $0x14c] sm:$0xf] }
  0xbe   :  { %v2350_v21 = vld [vmem:[#allocation8 + $0x26c] sm:$0xf]  ;;  %v1800_v24 = vor.u32 %v2314_v17, %v1797_v18  ;;  %v2408_v53 = vld [vmem:[#allocation11 + $0x38] sm:$0xff]  ;;  %v2409_v17 = vld [vmem:[#allocation11 + $0x40] sm:$0xff] }
  0xbf   :  { %1151 = vmatpush.bf16.msrb.mxu2 %v1956_v44  ;;  %v2008_v44 = vor.u32 %v2366_v31, %v2005_v32  ;;  %v2382_v25 = vld [vmem:[#allocation8 + $0x36c] sm:$0xf]  ;;  %v2021_v59 = vld [vmem:[#allocation8 + $0x318] sm:$0xf0]  ;;  %v2421_v18 = vld [vmem:[#allocation11 + $0xa0] sm:$0xff] }
  0xc0   :  { %1164 = vmatpush.bf16.msrb.mxu3 %v2084_v45  ;;  %1127 = vmatpush.bf16.msrb.mxu0 %v1668_v49  ;;  %v2136_v45 = vor.u32 %v2398_v35, %v2133_v36  ;;  %v1720_v49 = vor.u32 %v2294_v37, %v1717_v39  ;;  %v2310_v29 = vld [vmem:[#allocation8 + $0x12c] sm:$0xf]  ;;  %v1656_v35 = vor.u32 %v2278_v27, %v1653_v28  ;;  %v2416_v1 = vld [vmem:[#allocation11 + $0x78] sm:$0xff] }
  0xc1   :  { %1140 = vmatpush.bf16.msrb.mxu1 %v1796_v50  ;;  %v1848_v50 = vor.u32 %v2326_v40, %v1845_v42  ;;  %v1784_v36 = vor.u32 %v2310_v29, %v1781_v30  ;;  %v2378_v37 = vld [vmem:[#allocation8 + $0x34c] sm:$0xf]  ;;  %v1637_v40 = vld [vmem:[#allocation8 + $0x18] sm:$0xf0] }
  0xc2   :  { %1104 = vmatmul.bf16.vlgmr.msra.gmra.mxu2 %v2706_v4  ;;  %v2274_v39 = vld [vmem:[#allocation8 + $0xc] sm:$0xf]  ;;  %v2404_v2 = vld [vmem:[#allocation11 + $0x18] sm:$0xff] }
  0xc3   :  { %1117 = vmatmul.bf16.vlgmr.msra.gmra.mxu3 %v2708_v10  ;;  %1152 = vmatpush.bf16.msrb.mxu2 %v1940_v57  ;;  %v1992_v57 = vor.u32 %v2362_v47, %v1989_v48  ;;  %v2306_v42 = vld [vmem:[#allocation8 + $0x10c] sm:$0xf]  ;;  %v1909_v48 = vld [vmem:[#allocation8 + $0x238] sm:$0xf0] }
  0xc4   :  { %1165 = vmatpush.bf16.msrb.mxu3 %v2068_v58  ;;  %1128 = vmatpush.bf16.msrb.mxu0 %v1652_v62  ;;  %v2120_v58 = vor.u32 %v2394_v51, %v2117_v52  ;;  %v1832_v62 = vor.u32 %v2322_v55, %v1829_v56  ;;  %v2342_v47 = vld [vmem:[#allocation8 + $0x22c] sm:$0xf]  ;;  %v2037_v52 = vld [vmem:[#allocation8 + $0x338] sm:$0xf0] }
  0xc5   :  { %1141 = vmatpush.bf16.msrb.mxu1 %v1780_v63  ;;  %v2390_v63 = vld [vmem:[#allocation8 + $0x3ac] sm:$0xf]  ;;  %v1912_v54 = vor.u32 %v2342_v47, %v1909_v48 }
  0xc6   :  { %v2374_v51 = vld [vmem:[#allocation8 + $0x32c] sm:$0xf] }
  0xc7   :  { %1153 = vmatpush.bf16.msrb.mxu2 %v1924_v7  ;;  %v2104_v7 = vor.u32 %v2390_v63, %v2101_v0  ;;  %v2040_v55 = vor.u32 %v2374_v51, %v2037_v52  ;;  %v2338_v56 = vld [vmem:[#allocation8 + $0x20c] sm:$0xf]  ;;  %v2405_v0 = vld [vmem:[#allocation11 + $0x20] sm:$0xff] }
  0xc8   :  { %1166 = vmatpush.bf16.msrb.mxu3 %v2052_v12  ;;  %1129 = vmatpush.bf16.msrb.mxu0 %v1636_v15  ;;  %v1816_v12 = vor.u32 %v2318_v3, %v1813_v5  ;;  %v2282_v15 = vld [vmem:[#allocation8 + $0x4c] sm:$0xf]  ;;  %v2403_v3 = vld [vmem:[#allocation11 + $0x10] sm:$0xff] }
  0xc9   :  { %1142 = vmatpush.bf16.msrb.mxu1 %v1764_v16  ;;  %v1669_v16 = vld [vmem:[#allocation8 + $0x58] sm:$0xf0]  ;;  %v2406_v63 = vld [vmem:[#allocation11 + $0x28] sm:$0xff] }
  0xca   :  { %v1672_v23 = vor.u32 %v2282_v15, %v1669_v16  ;;  %v2414_v5 = vld [vmem:[#allocation11 + $0x68] sm:$0xff] }
  0xcb   :  { %1154 = vmatpush.bf16.msrb.mxu2 %v1908_v22  ;;  %1130 = vmatmul.bf16.vlgmr.msrb.gmra.mxu0 %v2700_v41  ;;  %v1941_v22 = vld [vmem:[#allocation8 + $0x278] sm:$0xf0]  ;;  %v2418_v28 = vld [vmem:[#allocation11 + $0x88] sm:$0xff] }
  0xcc   :  { %1174 = vmatpush.bf16.msra.mxu0 %v1752_v19  ;;  %1167 = vmatpush.bf16.msrb.mxu3 %v2036_v26  ;;  %v1960_v19 = vor.u32 %v2354_v8, %v1957_v9  ;;  %v2069_v26 = vld [vmem:[#allocation8 + $0x378] sm:$0xf0]  ;;  %v1944_v31 = vor.u32 %v2350_v21, %v1941_v22  ;;  %v2411_v8 = vld [vmem:[#allocation11 + $0x50] sm:$0xff] }
  0xcd   :  { %1187 = vmatpush.bf16.msra.mxu1 %v1880_v20  ;;  %v2088_v20 = vor.u32 %v2386_v13, %v2085_v14  ;;  %v2072_v32 = vor.u32 %v2382_v25, %v2069_v26  ;;  %v2423_v9 = vld [vmem:[#allocation11 + $0xb0] sm:$0xff]  ;;  %v2422_v13 = vld [vmem:[#allocation11 + $0xa8] sm:$0xff] }
  0xce   :  { %1143 = vmatmul.bf16.vlgmr.msrb.gmra.mxu1 %v2702_v46 }
  0xcf   :  { %1155 = vmatpush.bf16.msrb.mxu2 %v1892_v38  ;;  %v2053_v38 = vld [vmem:[#allocation8 + $0x358] sm:$0xf0] }
  0xd0   :  { %1175 = vmatpush.bf16.msra.mxu0 %v1736_v33  ;;  %1168 = vmatpush.bf16.msrb.mxu3 %v2020_v43  ;;  %v2346_v33 = vld [vmem:[#allocation8 + $0x24c] sm:$0xf]  ;;  %v1765_v43 = vld [vmem:[#allocation8 + $0x118] sm:$0xf0] }
  0xd1   :  { %1188 = vmatpush.bf16.msra.mxu1 %v1864_v34  ;;  %v1925_v34 = vld [vmem:[#allocation8 + $0x258] sm:$0xf0] }
  0xd2   :  { %1156 = vmatmul.bf16.vlgmr.msrb.gmra.mxu2 %v2706_v4 }
  0xd3   :  { %1200 = vmatpush.bf16.msra.mxu2 %v2008_v44  ;;  %1169 = vmatmul.bf16.vlgmr.msrb.gmra.mxu3 %v2708_v10  ;;  %v1928_v44 = vor.u32 %v2346_v33, %v1925_v34  ;;  %v2417_v33 = vld [vmem:[#allocation11 + $0x80] sm:$0xff]  ;;  %v2432_v34 = vld [vmem:[#allocation11 + $0xf8] sm:$0xff] }
  0xd4   :  { %1213 = vmatpush.bf16.msra.mxu3 %v2136_v45  ;;  %1176 = vmatpush.bf16.msra.mxu0 %v1720_v49  ;;  %v2056_v45 = vor.u32 %v2378_v37, %v2053_v38  ;;  %v1640_v49 = vor.u32 %v2274_v39, %v1637_v40  ;;  %v2431_v39 = vld [vmem:[#allocation11 + $0xf0] sm:$0xff] }
  0xd5   :  { %1189 = vmatpush.bf16.msra.mxu1 %v1848_v50  ;;  %v1768_v50 = vor.u32 %v2306_v42, %v1765_v43 }
  0xd7   :  { %1201 = vmatpush.bf16.msra.mxu2 %v1992_v57  ;;  %v1893_v57 = vld [vmem:[#allocation8 + $0x218] sm:$0xf0] }
  0xd8   :  { %1214 = vmatpush.bf16.msra.mxu3 %v2120_v58  ;;  %1177 = vmatpush.bf16.msra.mxu0 %v1704_v61  ;;  %v2370_v58 = vld [vmem:[#allocation8 + $0x30c] sm:$0xf]  ;;  %v1896_v61 = vor.u32 %v2338_v56, %v1893_v57 }
  0xd9   :  { %1190 = vmatpush.bf16.msra.mxu1 %v1832_v62  ;;  %v2024_v62 = vor.u32 %v2370_v58, %v2021_v59 }
  0xdb   :  { %1202 = vmatpush.bf16.msra.mxu2 %v1976_v6  ;;  %v2401_v6 = vld [vmem:[#allocation11] sm:$0xff] }
  0xdc   :  { %1215 = vmatpush.bf16.msra.mxu3 %v2104_v7  ;;  %1178 = vmatpush.bf16.msra.mxu0 %v1688_v11  ;;  %v2413_v7 = vld [vmem:[#allocation11 + $0x60] sm:$0xff]  ;;  %v2724_v11 = vld [vmem:[#allocation10] sm:$0xf] }
  0xdd   :  { %1191 = vmatpush.bf16.msra.mxu1 %v1816_v12  ;;  %v2410_v12 = vld [vmem:[#allocation11 + $0x48] sm:$0xff]  ;;  %v370_v16 = vperm.slane %v2724_v11, 0  ;;  %v372_v57 = vperm.slane %v2724_v11, 2 }
  0xdf   :  { %1203 = vmatpush.bf16.msra.mxu2 %v1960_v19 }
  0xe0   :  { %1216 = vmatpush.bf16.msra.mxu3 %v2088_v20  ;;  %1179 = vmatpush.bf16.msra.mxu0 %v1672_v23  ;;  %v2420_v20 = vld [vmem:[#allocation11 + $0x98] sm:$0xff] }
  0xe1   :  { %1192 = vmatpush.bf16.msra.mxu1 %v1800_v24  ;;  %v2419_v24 = vld [vmem:[#allocation11 + $0x90] sm:$0xff] }
  0xe3   :  { %1204 = vmatpush.bf16.msra.mxu2 %v1944_v31 }
  0xe4   :  { %1217 = vmatpush.bf16.msra.mxu3 %v2072_v32  ;;  %1180 = vmatpush.bf16.msra.mxu0 %v1656_v35 }
  0xe5   :  { %1193 = vmatpush.bf16.msra.mxu1 %v1784_v36  ;;  %v371_v36 = vperm.slane %v2724_v11, 1 }
  0xe7   :  { %1205 = vmatpush.bf16.msra.mxu2 %v1928_v44  ;;  %v2430_v44 = vld [vmem:[#allocation11 + $0xe8] sm:$0xff] }
  0xe8   :  { %1218 = vmatpush.bf16.msra.mxu3 %v2056_v45  ;;  %1181 = vmatpush.bf16.msra.mxu0 %v1640_v49 }
  0xe9   :  { %1194 = vmatpush.bf16.msra.mxu1 %v1768_v50  ;;  %v2429_v50 = vld [vmem:[#allocation11 + $0xe0] sm:$0xff] }
  0xeb   :  { %1206 = vmatpush.bf16.msra.mxu2 %v1912_v54  ;;  %1182 = vmatmul.bf16.vlgmr.msra.gmra.mxu0 %v2700_v41  ;;  %v2415_v41 = vld [vmem:[#allocation11 + $0x70] sm:$0xff] }
  0xec   :  { %1494 = vmatpush.bf16.msrb.mxu0 %v2408_v53  ;;  %1219 = vmatpush.bf16.msra.mxu3 %v2040_v55  ;;  %v2428_v53 = vld [vmem:[#allocation11 + $0xd8] sm:$0xff] }
  0xed   :  { %1195 = vmatmul.bf16.vlgmr.msra.gmra.mxu1 %v2702_v46  ;;  %v2402_v46 = vld [vmem:[#allocation11 + $0x8] sm:$0xff] }
  0xee   :  { %1507 = vmatpush.bf16.msrb.mxu1 %v2416_v1 }
  0xef   :  { %1207 = vmatpush.bf16.msra.mxu2 %v1896_v61 }
  0xf0   :  { %1495 = vmatpush.bf16.msrb.mxu0 %v2407_v60  ;;  %1220 = vmatpush.bf16.msra.mxu3 %v2024_v62  ;;  %v2427_v60 = vld [vmem:[#allocation11 + $0xd0] sm:$0xff] }
  0xf2   :  { %1208 = vmatmul.bf16.vlgmr.msra.gmra.mxu2 %v2706_v4  ;;  %1508 = vmatpush.bf16.msrb.mxu1 %v2415_v41  ;;  %v2412_v4 = vld [vmem:[#allocation11 + $0x58] sm:$0xff] }
  0xf3   :  { %1221 = vmatmul.bf16.vlgmr.msra.gmra.mxu3 %v2708_v10  ;;  %v2424_v10 = vld [vmem:[#allocation11 + $0xb8] sm:$0xff] }
  0xf4   :  { %1496 = vmatpush.bf16.msrb.mxu0 %v2406_v63  ;;  %1520 = vmatpush.bf16.msrb.mxu2 %v2424_v10 }
  0xf5   :  { %1533 = vmatpush.bf16.msrb.mxu3 %v2432_v34 }
  0xf6   :  { %1509 = vmatpush.bf16.msrb.mxu1 %v2414_v5 }
  0xf8   :  { %1497 = vmatpush.bf16.msrb.mxu0 %v2405_v0  ;;  %1521 = vmatpush.bf16.msrb.mxu2 %v2423_v9  ;;  %v2426_v0 = vld [vmem:[#allocation11 + $0xc8] sm:$0xff] }
  0xf9   :  { %1534 = vmatpush.bf16.msrb.mxu3 %v2431_v39 }
  0xfa   :  { %1510 = vmatpush.bf16.msrb.mxu1 %v2413_v7 }
  0xfc   :  { %1498 = vmatpush.bf16.msrb.mxu0 %v2404_v2  ;;  %1522 = vmatpush.bf16.msrb.mxu2 %v2422_v13 }
  0xfd   :  { %1535 = vmatpush.bf16.msrb.mxu3 %v2430_v44 }
  0xfe   :  { %1511 = vmatpush.bf16.msrb.mxu1 %v2412_v4 }
 0x100   :  { %1499 = vmatpush.bf16.msrb.mxu0 %v2403_v3  ;;  %1523 = vmatpush.bf16.msrb.mxu2 %v2421_v18 }
 0x101   :  { %1536 = vmatpush.bf16.msrb.mxu3 %v2429_v50 }
 0x102   :  { %1512 = vmatpush.bf16.msrb.mxu1 %v2411_v8 }
 0x104   :  { %1500 = vmatpush.bf16.msrb.mxu0 %v2402_v46  ;;  %1524 = vmatpush.bf16.msrb.mxu2 %v2420_v20  ;;  %v2425_v46 = vld [vmem:[#allocation11 + $0xc0] sm:$0xff] }
 0x105   :  { %1537 = vmatpush.bf16.msrb.mxu3 %v2428_v53 }
 0x106   :  { %1513 = vmatpush.bf16.msrb.mxu1 %v2410_v12  ;;  %v373_v12 = vperm.slane %v2724_v11, 3  ;;  %v2444_v11 = vld [vmem:[%s2742_s6] ss:$0 sm:$0xff]  ;;  %s2637_s6 = smov [#allocation13]  }
 0x107   :  { %s1574_s8 = sshll.u32 %s2637_s6, 4  ;;  %s1575_s8 = int_to_ptr.vmem [resolvable:$true] %s1574_s8 }
 0x108   :  { %1501 = vmatpush.bf16.msrb.mxu0 %v2401_v6  ;;  %1525 = vmatpush.bf16.msrb.mxu2 %v2419_v24 }
 0x109   :  { %1538 = vmatpush.bf16.msrb.mxu3 %v2427_v60 }
 0x10a   :  { %1514 = vmatpush.bf16.msrb.mxu1 %v2409_v17 }
 0x10c   :  { %1526 = vmatpush.bf16.msrb.mxu2 %v2418_v28 }
 0x10d   :  { %1539 = vmatpush.bf16.msrb.mxu3 %v2426_v0 }
 0x110   :  { %1527 = vmatpush.bf16.msrb.mxu2 %v2417_v33 }
 0x111   :  { %1540 = vmatpush.bf16.msrb.mxu3 %v2425_v46 }
 0x127   :  { %v1027_v14 = vpop.f32.mrf.mxu0 }
 0x128   :  { %v1040_v15 = vpop.f32.mrf.mxu1  ;;  %v1028_v19 = vadd.f32 %v1027_v14, %v370_v16 }
 0x12a   :  { %v1041_v23 = vadd.f32 %v1040_v15, %v1028_v19 }
 0x12f   :  { %v1029_v21 = vpop.f32.mrf.mxu0 }
 0x130   :  { %v1042_v22 = vpop.f32.mrf.mxu1 }
 0x135   :  { %v1053_v25 = vpop.f32.mrf.mxu2 }
 0x136   :  { %v1054_v26 = vadd.f32 %v1053_v25, %v1041_v23  ;;  %v1066_v27 = vpop.f32.mrf.mxu3 }
 0x137   :  { %v1079_v30 = vpop.f32.mrf.mxu0 }
 0x138   :  { %v1067_v29 = vadd.f32 %v1066_v27, %v1054_v26  ;;  %v1092_v31 = vpop.f32.mrf.mxu1  ;;  %v1080_v40 = vadd.f32 %v1079_v30, %v371_v36 }
 0x13a   :  { %v1226_v32 = vmax.f32 %v1067_v29, 0.0  ;;  %v1093_v45 = vadd.f32 %v1092_v31, %v1080_v40 }
 0x13c   :  { %v1230_v35 = vpack.c.bf16 %v1226_v32, %v1226_v32 }
 0x13d   :  { %v1055_v37 = vpop.f32.mrf.mxu2 }
 0x13e   :  { %v1068_v38 = vpop.f32.mrf.mxu3  ;;  %1502 = vmatmul.bf16.vlgmr.msrb.gmra.mxu0 %v1230_v35 }
 0x13f   :  { %v1081_v42 = vpop.f32.mrf.mxu0 }
 0x140   :  { %v1094_v43 = vpop.f32.mrf.mxu1 }
 0x145   :  { %v1105_v47 = vpop.f32.mrf.mxu2 }
 0x146   :  { %v1106_v48 = vadd.f32 %v1105_v47, %v1093_v45  ;;  %v1118_v49 = vpop.f32.mrf.mxu3 }
 0x148   :  { %v1119_v51 = vadd.f32 %v1118_v49, %v1106_v48  ;;  %v1131_v52 = vpop.f32.mrf.mxu0 }
 0x149   :  { %v1132_v61 = vadd.f32 %v1131_v52, %v372_v57 }
 0x14a   :  { %v1227_v54 = vmax.f32 %v1119_v51, 0.0 }
 0x14b   :  { %v1144_v55 = vpop.f32.mrf.mxu1 }
 0x14c   :  { %v1231_v56 = vpack.c.bf16 %v1227_v54, %v1227_v54  ;;  %v1145_v1 = vadd.f32 %v1144_v55, %v1132_v61 }
 0x14d   :  { %v1107_v58 = vpop.f32.mrf.mxu2 }
 0x14e   :  { %v1120_v59 = vpop.f32.mrf.mxu3  ;;  %1515 = vmatmul.bf16.vlgmr.msrb.gmra.mxu1 %v1231_v56 }
 0x150   :  { %v1133_v62 = vpop.f32.mrf.mxu0 }
 0x153   :  { %v1146_v63 = vpop.f32.mrf.mxu1 }
 0x155   :  { %v1157_v2 = vpop.f32.mrf.mxu2 }
 0x156   :  { %v1170_v3 = vpop.f32.mrf.mxu3  ;;  %v1158_v41 = vadd.f32 %v1157_v2, %v1145_v1 }
 0x158   :  { %v1171_v5 = vadd.f32 %v1170_v3, %v1158_v41 }
 0x15a   :  { %v1228_v6 = vmax.f32 %v1171_v5, 0.0 }
 0x15c   :  { %v1232_v7 = vpack.c.bf16 %v1228_v6, %v1228_v6 }
 0x15d   :  { %v1159_v4 = vpop.f32.mrf.mxu2 }
 0x15e   :  { %v1172_v10 = vpop.f32.mrf.mxu3  ;;  %1528 = vmatmul.bf16.vlgmr.msrb.gmra.mxu2 %v1232_v7 }
 0x168   :  { %v1183_v8 = vpop.f32.mrf.mxu0 }
 0x169   :  { %v1184_v13 = vadd.f32 %v1183_v8, %v373_v12 }
 0x16a   :  { %v1196_v9 = vpop.f32.mrf.mxu1 }
 0x16b   :  { %v1197_v16 = vadd.f32 %v1196_v9, %v1184_v13 }
 0x170   :  { %v1185_v14 = vpop.f32.mrf.mxu0 }
 0x172   :  { %v1198_v15 = vpop.f32.mrf.mxu1 }
 0x175   :  { %v1209_v17 = vpop.f32.mrf.mxu2 }
 0x176   :  { %v1210_v18 = vadd.f32 %v1209_v17, %v1197_v16  ;;  %v1222_v19 = vpop.f32.mrf.mxu3 }
 0x178   :  { %v1223_v20 = vadd.f32 %v1222_v19, %v1210_v18 }
 0x17a   :  { %v1229_v21 = vmax.f32 %v1223_v20, 0.0 }
 0x17c   :  { %v1233_v22 = vpack.c.bf16 %v1229_v21, %v1229_v21 }
 0x17d   :  { %v1211_v23 = vpop.f32.mrf.mxu2 }
 0x17e   :  { %v1224_v24 = vpop.f32.mrf.mxu3  ;;  %1541 = vmatmul.bf16.vlgmr.msrb.gmra.mxu3 %v1233_v22 }
 0x1bb   :  { %v1503_v25 = vpop.f32.mrf.mxu0 }
 0x1bc   :  { %v1504_v31 = vadd.f32 %v2444_v11, %v1503_v25 }
 0x1c3   :  { %v1505_v26 = vpop.f32.mrf.mxu0 }
 0x1cb   :  { %v1516_v27 = vpop.f32.mrf.mxu1 }
 0x1cc   :  { %v1517_v32 = vadd.f32 %v1516_v27, %v1504_v31 }
 0x1d3   :  { %v1518_v28 = vpop.f32.mrf.mxu1 }
 0x1e1   :  { %v1529_v29 = vpop.f32.mrf.mxu2 }
 0x1e2   :  { %v1530_v33 = vadd.f32 %v1529_v29, %v1517_v32 }
 0x1e9   :  { %v1531_v30 = vpop.f32.mrf.mxu2 }
 0x201   :  { %v1542_v34 = vpop.f32.mrf.mxu3 }
 0x202   :  { %v1543_v35 = vadd.f32 %v1542_v34, %v1530_v33 }
 0x204   :  { %1546 = vmax.xlane.f32.xlu0 %v1543_v35 }
 0x209   :  { %v1544_v36 = vpop.f32.mrf.mxu3 }
 0x277   :  { %v1547_v37 = vpop.xlane.xlu0 %1546 }
 0x278   :  { %v1548_v38 = vsub.f32 %v1543_v35, %v1547_v37 }
 0x27a   :  { %v1549_v39 = vmul.f32 1.442695, %v1548_v38 }
 0x27c   :  { %2445 = vpow2.f32 %v1549_v39 }
 0x282   :  { %v2446_v40 = vpop.eup %2445 }
 0x283   :  { %1551 = vadd.xlane.f32.xlu0 %v2446_v40 }
 0x2f6   :  { %v1552_v42 = vpop.xlane.xlu0 %1551 }
 0x2f7   :  { %2447 = vrcp.f32 %v1552_v42  ;;  %v1564_v47 = vand.u32 2147483648, %v1552_v42  ;;  %v1562_v49 = vand.u32 2147483647, %v1552_v42  ;;  %vm1558_vm2 = vweird.f32 %v1552_v42 }
 0x2f9   :  { %v1565_v51 = vor.u32 1.1754944e-38, %v1564_v47  ;;  %vm1563_vm4 = vcmp.eq.f32.partialorder %v1562_v49, 8.507059e+37 }
 0x2fd   :  { %v2448_v43 = vpop.eup %2447 }
 0x2fe   :  { %v1554_v44 = vmul.f32 %v2448_v43, %v1552_v42  ;;  %vm1559_vm1 = vweird.f32 %v2448_v43 }
 0x2ff   :  { %vm1560_vm3 = vmor %vm1558_vm2, %vm1559_vm1 }
 0x300   :  { %v1555_v45 = vsub.f32 1.0, %v1554_v44 }
 0x302   :  { %v1556_v48 = vmul.f32 %v2448_v43, %v1555_v45 }
 0x304   :  { %v1557_v50 = vadd.f32 %v2448_v43, %v1556_v48 }
 0x306   :  { %v1561_v52 = vsel %vm1560_vm3, %v2448_v43, %v1557_v50 }
 0x307   :  { %v1566_v53 = vsel %vm1563_vm4, %v1565_v51, %v1561_v52 }
 0x308   :  { %v1567_v54 = vmul.f32 %v2446_v40, %v1566_v53 }
 0x30a   :  { %1568 = vst [vmem:[#allocation13] sm:$0xff] %v1567_v54 }
 0x30b   :  { %1579 = dma.vmem_to_hbm [thread:$0]  %s1575_s8, 128, %s1577_s11, [#allocation4]  }
 0x30c   :  { %2625 = dma.done.wait [#allocation4], 128  }
 0x30d   :  { %2626 = vsyncadd [#allocation4], 4294967168 }
 0x30e   :  { %1584 = vsyncpa [#allocation3], 1 }
 0x30f   :  { %1585 = vsyncpa [#allocation6], 1 }
 0x310   :  { %1586 = vsyncpa [#allocation9], 1 }
 0x311   :  { %1587 = vsyncpa [#allocation12], 1 }
 0x312   :  { %1588 = vsyncpa [#allocation4], 1 }

</bundles_post_ra>
